<compile_context>
chip_gen: v5e
topology: v5e:2x2
jax: 0.10.0
libtpu: 0.0.40
codegen_flags: <defaults>
</compile_context>

<pallas_src>
import functools

import jax
import jax.numpy as jnp
from jax import lax
from jax.experimental import pallas as pl
from jax.experimental.pallas import tpu as pltpu


# dot_general dimension numbers: contract the sublane (channel) axis of both
# 2-D operands, i.e. A^T @ B.  The implicit transpose lands on the small
# (C, N) lhs, never on the (N, N) probability matrix.
_TN = (((0,), (0,)), ((), ()))


def _concat_lanes(ref, b_blk):
    """(b_blk, C, N) block -> (C, b_blk*N) value (batch folded into lanes)."""
    if b_blk == 1:
        return ref[0]
    return jnp.concatenate([ref[b] for b in range(b_blk)], axis=-1)


def _cross_attn_kernel(img_ref, msk_ref,
                       wq_ref, wk_ref, wv_ref, wo_ref, bias_ref,
                       out_ref, *, b_blk, n):
    # img_ref: (b_blk, C_img, N) f32     msk_ref: (b_blk, C_mask, N) f32
    # w*_ref:  (C_out, C_in) bf16        bias_ref: (C_out, 4) f32
    img_f32 = _concat_lanes(img_ref, b_blk)              # (C_img, b_blk*N) f32
    img = img_f32.astype(jnp.bfloat16)
    msk = _concat_lanes(msk_ref, b_blk).astype(jnp.bfloat16)

    bq = bias_ref[:, 0:1]                                 # scale already folded in
    bk = bias_ref[:, 1:2]
    bv = bias_ref[:, 2:3]
    bo = bias_ref[:, 3:4]

    # 1x1 convolutions == channel matmuls, done once per grid step over the
    # whole batch block (bf16 operands, f32 accumulation).
    q_all = jnp.dot(wq_ref[...], msk, preferred_element_type=jnp.float32) + bq
    k_all = jnp.dot(wk_ref[...], img, preferred_element_type=jnp.float32) + bk
    v_all = jnp.dot(wv_ref[...], img, preferred_element_type=jnp.float32) + bv

    # Attention per batch element (b_blk is a small static count).
    for b in range(b_blk):
        sl = slice(b * n, (b + 1) * n)                    # lane-aligned static slice
        q = q_all[:, sl].astype(jnp.bfloat16)             # (C_out, N)
        k = k_all[:, sl].astype(jnp.bfloat16)
        v = v_all[:, sl].astype(jnp.bfloat16)

        # s[m, n] = sum_c k[c, m] * q[c, n]   -> (N_key, N_query)
        s = lax.dot_general(k, q, _TN, preferred_element_type=jnp.float32)
        s = s - jnp.max(s, axis=0, keepdims=True)
        p = jnp.exp(s)                                    # unnormalized probs
        l = jnp.sum(p, axis=0, keepdims=True)             # (1, N_query)

        # av[c, n] = sum_m v[c, m] * p[m, n]  -- canonical matmul, no transpose
        av = jnp.dot(v, p.astype(jnp.bfloat16), preferred_element_type=jnp.float32)
        # Deferred softmax normalization: O(C*N) instead of O(N*N).
        av = av * pl.reciprocal(l, approx=True)

        out = (img_f32[:, sl]
               + jnp.dot(wo_ref[...], av.astype(jnp.bfloat16),
                         preferred_element_type=jnp.float32)
               + bo)
        out_ref[b] = out.astype(out_ref.dtype)


def prepare_params(params):
    """One-time parameter preparation: fold softmax scale into Wq/bq, cast
    weights to bf16, pack the four biases into a single (C_out, 4) array."""
    c_out = params["wq"].shape[0]
    scale = float(c_out) ** (-0.5)
    bias = jnp.stack(
        [params["bq"] * scale, params["bk"], params["bv"], params["bo"]],
        axis=1).astype(jnp.float32)                       # (C_out, 4)
    return {
        "wq": (params["wq"] * scale).astype(jnp.bfloat16),
        "wk": params["wk"].astype(jnp.bfloat16),
        "wv": params["wv"].astype(jnp.bfloat16),
        "wo": params["wo"].astype(jnp.bfloat16),
        "bias": bias,
    }


def _pick_batch_block(batch):
    # v7x has 2 TensorCores: keep >= 2 grid steps so the "parallel" batch axis
    # can shard across them; within that constraint make steps as fat as
    # possible to amortize per-step overhead (v5e/v6e have 1 TC so fewer,
    # fatter steps are strictly better there too).
    if batch >= 2 and batch % 2 == 0:
        return batch // 2
    return 1


def cross_attention_fusion(image_feat, mask_feat, prepared, *, batch_block=None):
    """image_feat: (B, C_img, H, W), mask_feat: (B, C_mask, H, W) -> (B, C_img, H, W)."""
    B, C_img, H, W = image_feat.shape
    _, C_mask, _, _ = mask_feat.shape
    C_out = prepared["wq"].shape[0]
    assert C_img == C_out, (
        "CrossAttentionFusion residual requires image_channels == output_channels")
    N = H * W

    b_blk = _pick_batch_block(B) if batch_block is None else batch_block
    assert B % b_blk == 0, "batch must be divisible by the batch block"
    num_blocks = B // b_blk

    # NCHW -> (B, C, N): pure reshapes, no transpose / extra HBM traffic.
    img = image_feat.reshape(B, C_img, N)
    msk = mask_feat.reshape(B, C_mask, N)

    def full_spec(shape):
        # Constant-index full-array blocks (weights / packed biases).
        return pl.BlockSpec(shape, lambda i: (0,) * len(shape))

    kernel = functools.partial(_cross_attn_kernel, b_blk=b_blk, n=N)

    out = pl.pallas_call(
        kernel,
        out_shape=jax.ShapeDtypeStruct((B, C_out, N), jnp.float32),
        grid_spec=pltpu.PrefetchScalarGridSpec(
            num_scalar_prefetch=0,
            grid=(num_blocks,),
            in_specs=[
                pl.BlockSpec((b_blk, C_img, N), lambda i: (i, 0, 0)),   # image feats
                pl.BlockSpec((b_blk, C_mask, N), lambda i: (i, 0, 0)),  # mask feats
                full_spec((C_out, C_mask)),                             # Wq * scale (bf16)
                full_spec((C_out, C_img)),                              # Wk (bf16)
                full_spec((C_out, C_img)),                              # Wv (bf16)
                full_spec((C_out, C_out)),                              # Wo (bf16)
                full_spec((C_out, 4)),                                  # packed biases
            ],
            out_specs=pl.BlockSpec((b_blk, C_out, N), lambda i: (i, 0, 0)),
        ),
        compiler_params=pltpu.CompilerParams(
            dimension_semantics=("parallel",)),
    )(img, msk, prepared["wq"], prepared["wk"], prepared["wv"], prepared["wo"],
      prepared["bias"])

    # (B, C_out, N) -> NCHW: pure reshape.
    return out.reshape(B, C_out, H, W)


def _reference(image_feat, mask_feat, params):
    """Pure-JAX reference mirroring the PyTorch forward exactly (all f32)."""
    B, C_img, H, W = image_feat.shape
    C_out = params["wq"].shape[0]
    N = H * W
    scale = float(C_out) ** (-0.5)

    def conv1x1(x, w, b):  # x: (B, C_in, N)
        return jnp.einsum("oc,bcn->bon", w, x) + b[None, :, None]

    img = image_feat.reshape(B, C_img, N)
    msk = mask_feat.reshape(B, -1, N)
    q = conv1x1(msk, params["wq"], params["bq"])
    k = conv1x1(img, params["wk"], params["bk"])
    v = conv1x1(img, params["wv"], params["bv"])
    attn = jnp.einsum("bcn,bcm->bnm", q, k) * scale
    attn = jax.nn.softmax(attn, axis=-1)
    av = jnp.einsum("bcm,bnm->bcn", v, attn)
    out = image_feat + conv1x1(av, params["wo"], params["bo"]).reshape(B, C_out, H, W)
    return out


if __name__ == "__main__":
    key = jax.random.PRNGKey(0)
    B, H, W = 4, 16, 16                                   # N = 256, 2 grid steps of 2 batches
    image_channels, mask_channels, output_channels = 32, 16, 32  # img == out (residual)

    keys = jax.random.split(key, 10)
    params = {
        "wq": 0.1 * jax.random.normal(keys[0], (output_channels, mask_channels), jnp.float32),
        "bq": 0.1 * jax.random.normal(keys[1], (output_channels,), jnp.float32),
        "wk": 0.1 * jax.random.normal(keys[2], (output_channels, image_channels), jnp.float32),
        "bk": 0.1 * jax.random.normal(keys[3], (output_channels,), jnp.float32),
        "wv": 0.1 * jax.random.normal(keys[4], (output_channels, image_channels), jnp.float32),
        "bv": 0.1 * jax.random.normal(keys[5], (output_channels,), jnp.float32),
        "wo": 0.1 * jax.random.normal(keys[6], (output_channels, output_channels), jnp.float32),
        "bo": 0.1 * jax.random.normal(keys[7], (output_channels,), jnp.float32),
    }

    image_feat = jax.random.normal(keys[8], (B, image_channels, H, W), jnp.float32)
    mask_feat = jax.random.normal(keys[9], (B, mask_channels, H, W), jnp.float32)

    prepared = prepare_params(params)                     # one-time prep (scale fold, bf16 cast)
    out = cross_attention_fusion(image_feat, mask_feat, prepared)
    out = jax.block_until_ready(out)

    ref = _reference(image_feat, mask_feat, params)
    assert out.shape == (B, output_channels, H, W)
    # bf16 matmul operands (f32 accumulation) + approx reciprocal introduce
    # small numeric differences vs. the exact-f32 reference.
    assert jnp.allclose(out, ref, atol=2e-2, rtol=2e-2), "mismatch vs reference"

    print("KERNEL_OK")
</pallas_src>

<mosaic_0001>
module attributes {stable_mosaic.version = 11 : i64} {
  func.func @_cross_attn_kernel(%arg0: i32, %arg1: memref<2x32x256xf32, #tpu.memory_space<vmem>>, %arg2: memref<2x16x256xf32, #tpu.memory_space<vmem>>, %arg3: memref<32x16xbf16, #tpu.memory_space<vmem>>, %arg4: memref<32x32xbf16, #tpu.memory_space<vmem>>, %arg5: memref<32x32xbf16, #tpu.memory_space<vmem>>, %arg6: memref<32x32xbf16, #tpu.memory_space<vmem>>, %arg7: memref<32x4xf32, #tpu.memory_space<vmem>>, %arg8: memref<2x32x256xf32, #tpu.memory_space<vmem>>) attributes {dimension_semantics = [#tpu.dimension_semantics<parallel>], iteration_bounds = array<i64: 2>, scalar_prefetch = 0 : i64, scratch_operands = 0 : i64, tpu.core_type = #tpu.core_type<tc>, window_params = [{transform_indices = @transform_0, window_bounds = array<i64: 2, 32, 256>}, {transform_indices = @transform_1, window_bounds = array<i64: 2, 16, 256>}, {pipeline_mode = #tpu.pipeline_mode<synchronous>, transform_indices = @transform_2, window_bounds = array<i64: 32, 16>}, {pipeline_mode = #tpu.pipeline_mode<synchronous>, transform_indices = @transform_3, window_bounds = array<i64: 32, 32>}, {pipeline_mode = #tpu.pipeline_mode<synchronous>, transform_indices = @transform_4, window_bounds = array<i64: 32, 32>}, {pipeline_mode = #tpu.pipeline_mode<synchronous>, transform_indices = @transform_5, window_bounds = array<i64: 32, 32>}, {pipeline_mode = #tpu.pipeline_mode<synchronous>, transform_indices = @transform_6, window_bounds = array<i64: 32, 4>}, {transform_indices = @transform_7, window_bounds = array<i64: 2, 32, 256>}]} {
    %c0 = arith.constant 0 : index
    %c0_0 = arith.constant 0 : index
    %c0_1 = arith.constant 0 : index
    %0 = vector.load %arg1[%c0, %c0_0, %c0_1] : memref<2x32x256xf32, #tpu.memory_space<vmem>>, vector<1x32x256xf32>
    %1 = vector.shape_cast %0 : vector<1x32x256xf32> to vector<32x256xf32>
    %c1 = arith.constant 1 : index
    %c0_2 = arith.constant 0 : index
    %c0_3 = arith.constant 0 : index
    %2 = vector.load %arg1[%c1, %c0_2, %c0_3] : memref<2x32x256xf32, #tpu.memory_space<vmem>>, vector<1x32x256xf32>
    %3 = vector.shape_cast %2 : vector<1x32x256xf32> to vector<32x256xf32>
    %4 = tpu.concatenate %1, %3 in 1 : vector<32x256xf32>, vector<32x256xf32> -> vector<32x512xf32>
    %5 = arith.truncf %4 : vector<32x512xf32> to vector<32x512xbf16>
    %c0_4 = arith.constant 0 : index
    %c0_5 = arith.constant 0 : index
    %c0_6 = arith.constant 0 : index
    %6 = vector.load %arg2[%c0_4, %c0_5, %c0_6] : memref<2x16x256xf32, #tpu.memory_space<vmem>>, vector<1x16x256xf32>
    %7 = vector.shape_cast %6 : vector<1x16x256xf32> to vector<16x256xf32>
    %c1_7 = arith.constant 1 : index
    %c0_8 = arith.constant 0 : index
    %c0_9 = arith.constant 0 : index
    %8 = vector.load %arg2[%c1_7, %c0_8, %c0_9] : memref<2x16x256xf32, #tpu.memory_space<vmem>>, vector<1x16x256xf32>
    %9 = vector.shape_cast %8 : vector<1x16x256xf32> to vector<16x256xf32>
    %10 = tpu.concatenate %7, %9 in 1 : vector<16x256xf32>, vector<16x256xf32> -> vector<16x512xf32>
    %11 = arith.truncf %10 : vector<16x512xf32> to vector<16x512xbf16>
    %c0_10 = arith.constant 0 : index
    %c0_11 = arith.constant 0 : index
    %12 = vector.load %arg7[%c0_10, %c0_11] : memref<32x4xf32, #tpu.memory_space<vmem>>, vector<32x1xf32>
    %c0_12 = arith.constant 0 : index
    %c1_13 = arith.constant 1 : index
    %13 = vector.load %arg7[%c0_12, %c1_13] : memref<32x4xf32, #tpu.memory_space<vmem>>, vector<32x1xf32>
    %c0_14 = arith.constant 0 : index
    %c2 = arith.constant 2 : index
    %14 = vector.load %arg7[%c0_14, %c2] : memref<32x4xf32, #tpu.memory_space<vmem>>, vector<32x1xf32>
    %c0_15 = arith.constant 0 : index
    %c3 = arith.constant 3 : index
    %15 = vector.load %arg7[%c0_15, %c3] : memref<32x4xf32, #tpu.memory_space<vmem>>, vector<32x1xf32>
    %c0_16 = arith.constant 0 : index
    %c0_17 = arith.constant 0 : index
    %16 = vector.load %arg3[%c0_16, %c0_17] : memref<32x16xbf16, #tpu.memory_space<vmem>>, vector<32x16xbf16>
    %cst = arith.constant dense<0.000000e+00> : vector<32x512xf32>
    %17 = tpu.matmul %16, %11, %cst {dimension_numbers = #tpu.dot_dimension_numbers<[1], [0], [0], [1], [0, 0, 1, 1], [], []>} : vector<32x16xbf16>, vector<16x512xbf16>, vector<32x512xf32> -> vector<32x512xf32>
    %18 = vector.broadcast %12 : vector<32x1xf32> to vector<32x512xf32>
    %19 = arith.addf %17, %18 : vector<32x512xf32>
    %c0_18 = arith.constant 0 : index
    %c0_19 = arith.constant 0 : index
    %20 = vector.load %arg4[%c0_18, %c0_19] : memref<32x32xbf16, #tpu.memory_space<vmem>>, vector<32x32xbf16>
    %cst_20 = arith.constant dense<0.000000e+00> : vector<32x512xf32>
    %21 = tpu.matmul %20, %5, %cst_20 {dimension_numbers = #tpu.dot_dimension_numbers<[1], [0], [0], [1], [0, 0, 1, 1], [], []>} : vector<32x32xbf16>, vector<32x512xbf16>, vector<32x512xf32> -> vector<32x512xf32>
    %22 = vector.broadcast %13 : vector<32x1xf32> to vector<32x512xf32>
    %23 = arith.addf %21, %22 : vector<32x512xf32>
    %c0_21 = arith.constant 0 : index
    %c0_22 = arith.constant 0 : index
    %24 = vector.load %arg5[%c0_21, %c0_22] : memref<32x32xbf16, #tpu.memory_space<vmem>>, vector<32x32xbf16>
    %cst_23 = arith.constant dense<0.000000e+00> : vector<32x512xf32>
    %25 = tpu.matmul %24, %5, %cst_23 {dimension_numbers = #tpu.dot_dimension_numbers<[1], [0], [0], [1], [0, 0, 1, 1], [], []>} : vector<32x32xbf16>, vector<32x512xbf16>, vector<32x512xf32> -> vector<32x512xf32>
    %26 = vector.broadcast %14 : vector<32x1xf32> to vector<32x512xf32>
    %27 = arith.addf %25, %26 : vector<32x512xf32>
    %28 = vector.extract_strided_slice %19 {offsets = [0, 0], sizes = [32, 256], strides = [1, 1]} : vector<32x512xf32> to vector<32x256xf32>
    %29 = arith.truncf %28 : vector<32x256xf32> to vector<32x256xbf16>
    %30 = vector.extract_strided_slice %23 {offsets = [0, 0], sizes = [32, 256], strides = [1, 1]} : vector<32x512xf32> to vector<32x256xf32>
    %31 = arith.truncf %30 : vector<32x256xf32> to vector<32x256xbf16>
    %32 = vector.extract_strided_slice %27 {offsets = [0, 0], sizes = [32, 256], strides = [1, 1]} : vector<32x512xf32> to vector<32x256xf32>
    %33 = arith.truncf %32 : vector<32x256xf32> to vector<32x256xbf16>
    %cst_24 = arith.constant dense<0.000000e+00> : vector<256x256xf32>
    %34 = tpu.matmul %31, %29, %cst_24 {dimension_numbers = #tpu.dot_dimension_numbers<[0], [0], [1], [1], [0, 1, 1, 1], [], []>} : vector<32x256xbf16>, vector<32x256xbf16>, vector<256x256xf32> -> vector<256x256xf32>
    %cst_25 = arith.constant dense<0xFF800000> : vector<256xf32>
    %35 = vector.multi_reduction <maximumf>, %34, %cst_25 [0] : vector<256x256xf32> to vector<256xf32>
    %36 = vector.shape_cast %35 : vector<256xf32> to vector<1x256xf32>
    %37 = vector.broadcast %36 : vector<1x256xf32> to vector<256x256xf32>
    %38 = arith.subf %34, %37 : vector<256x256xf32>
    %39 = math.exp %38 : vector<256x256xf32>
    %cst_26 = arith.constant dense<0.000000e+00> : vector<256xf32>
    %40 = vector.multi_reduction <add>, %39, %cst_26 [0] : vector<256x256xf32> to vector<256xf32>
    %41 = vector.shape_cast %40 : vector<256xf32> to vector<1x256xf32>
    %42 = arith.truncf %39 : vector<256x256xf32> to vector<256x256xbf16>
    %cst_27 = arith.constant dense<0.000000e+00> : vector<32x256xf32>
    %43 = tpu.matmul %33, %42, %cst_27 {dimension_numbers = #tpu.dot_dimension_numbers<[1], [0], [0], [1], [0, 0, 1, 1], [], []>} : vector<32x256xbf16>, vector<256x256xbf16>, vector<32x256xf32> -> vector<32x256xf32>
    %44 = tpu.reciprocal %41 {approx = true} : vector<1x256xf32> -> vector<1x256xf32>
    %45 = vector.broadcast %44 : vector<1x256xf32> to vector<32x256xf32>
    %46 = arith.mulf %43, %45 : vector<32x256xf32>
    %47 = vector.extract_strided_slice %4 {offsets = [0, 0], sizes = [32, 256], strides = [1, 1]} : vector<32x512xf32> to vector<32x256xf32>
    %c0_28 = arith.constant 0 : index
    %c0_29 = arith.constant 0 : index
    %48 = vector.load %arg6[%c0_28, %c0_29] : memref<32x32xbf16, #tpu.memory_space<vmem>>, vector<32x32xbf16>
    %49 = arith.truncf %46 : vector<32x256xf32> to vector<32x256xbf16>
    %cst_30 = arith.constant dense<0.000000e+00> : vector<32x256xf32>
    %50 = tpu.matmul %48, %49, %cst_30 {dimension_numbers = #tpu.dot_dimension_numbers<[1], [0], [0], [1], [0, 0, 1, 1], [], []>} : vector<32x32xbf16>, vector<32x256xbf16>, vector<32x256xf32> -> vector<32x256xf32>
    %51 = arith.addf %47, %50 : vector<32x256xf32>
    %52 = vector.broadcast %15 : vector<32x1xf32> to vector<32x256xf32>
    %53 = arith.addf %51, %52 : vector<32x256xf32>
    %c0_31 = arith.constant 0 : index
    %c0_32 = arith.constant 0 : index
    %c0_33 = arith.constant 0 : index
    %54 = vector.load %arg8[%c0_31, %c0_32, %c0_33] : memref<2x32x256xf32, #tpu.memory_space<vmem>>, vector<1x32x256xf32>
    %55 = vector.shape_cast %54 : vector<1x32x256xf32> to vector<32x256xf32>
    %56 = vector.shape_cast %53 : vector<32x256xf32> to vector<1x32x256xf32>
    tpu.vector_store %arg8[%c0_31, %c0_32, %c0_33], %56 {strides = array<i32>} : memref<2x32x256xf32, #tpu.memory_space<vmem>>, vector<1x32x256xf32>,
    %57 = vector.extract_strided_slice %19 {offsets = [0, 256], sizes = [32, 256], strides = [1, 1]} : vector<32x512xf32> to vector<32x256xf32>
    %58 = arith.truncf %57 : vector<32x256xf32> to vector<32x256xbf16>
    %59 = vector.extract_strided_slice %23 {offsets = [0, 256], sizes = [32, 256], strides = [1, 1]} : vector<32x512xf32> to vector<32x256xf32>
    %60 = arith.truncf %59 : vector<32x256xf32> to vector<32x256xbf16>
    %61 = vector.extract_strided_slice %27 {offsets = [0, 256], sizes = [32, 256], strides = [1, 1]} : vector<32x512xf32> to vector<32x256xf32>
    %62 = arith.truncf %61 : vector<32x256xf32> to vector<32x256xbf16>
    %cst_34 = arith.constant dense<0.000000e+00> : vector<256x256xf32>
    %63 = tpu.matmul %60, %58, %cst_34 {dimension_numbers = #tpu.dot_dimension_numbers<[0], [0], [1], [1], [0, 1, 1, 1], [], []>} : vector<32x256xbf16>, vector<32x256xbf16>, vector<256x256xf32> -> vector<256x256xf32>
    %cst_35 = arith.constant dense<0xFF800000> : vector<256xf32>
    %64 = vector.multi_reduction <maximumf>, %63, %cst_35 [0] : vector<256x256xf32> to vector<256xf32>
    %65 = vector.shape_cast %64 : vector<256xf32> to vector<1x256xf32>
    %66 = vector.broadcast %65 : vector<1x256xf32> to vector<256x256xf32>
    %67 = arith.subf %63, %66 : vector<256x256xf32>
    %68 = math.exp %67 : vector<256x256xf32>
    %cst_36 = arith.constant dense<0.000000e+00> : vector<256xf32>
    %69 = vector.multi_reduction <add>, %68, %cst_36 [0] : vector<256x256xf32> to vector<256xf32>
    %70 = vector.shape_cast %69 : vector<256xf32> to vector<1x256xf32>
    %71 = arith.truncf %68 : vector<256x256xf32> to vector<256x256xbf16>
    %cst_37 = arith.constant dense<0.000000e+00> : vector<32x256xf32>
    %72 = tpu.matmul %62, %71, %cst_37 {dimension_numbers = #tpu.dot_dimension_numbers<[1], [0], [0], [1], [0, 0, 1, 1], [], []>} : vector<32x256xbf16>, vector<256x256xbf16>, vector<32x256xf32> -> vector<32x256xf32>
    %73 = tpu.reciprocal %70 {approx = true} : vector<1x256xf32> -> vector<1x256xf32>
    %74 = vector.broadcast %73 : vector<1x256xf32> to vector<32x256xf32>
    %75 = arith.mulf %72, %74 : vector<32x256xf32>
    %76 = vector.extract_strided_slice %4 {offsets = [0, 256], sizes = [32, 256], strides = [1, 1]} : vector<32x512xf32> to vector<32x256xf32>
    %c0_38 = arith.constant 0 : index
    %c0_39 = arith.constant 0 : index
    %77 = vector.load %arg6[%c0_38, %c0_39] : memref<32x32xbf16, #tpu.memory_space<vmem>>, vector<32x32xbf16>
    %78 = arith.truncf %75 : vector<32x256xf32> to vector<32x256xbf16>
    %cst_40 = arith.constant dense<0.000000e+00> : vector<32x256xf32>
    %79 = tpu.matmul %77, %78, %cst_40 {dimension_numbers = #tpu.dot_dimension_numbers<[1], [0], [0], [1], [0, 0, 1, 1], [], []>} : vector<32x32xbf16>, vector<32x256xbf16>, vector<32x256xf32> -> vector<32x256xf32>
    %80 = arith.addf %76, %79 : vector<32x256xf32>
    %81 = vector.broadcast %15 : vector<32x1xf32> to vector<32x256xf32>
    %82 = arith.addf %80, %81 : vector<32x256xf32>
    %c1_41 = arith.constant 1 : index
    %c0_42 = arith.constant 0 : index
    %c0_43 = arith.constant 0 : index
    %83 = vector.load %arg8[%c1_41, %c0_42, %c0_43] : memref<2x32x256xf32, #tpu.memory_space<vmem>>, vector<1x32x256xf32>
    %84 = vector.shape_cast %83 : vector<1x32x256xf32> to vector<32x256xf32>
    %85 = vector.shape_cast %82 : vector<32x256xf32> to vector<1x32x256xf32>
    tpu.vector_store %arg8[%c1_41, %c0_42, %c0_43], %85 {strides = array<i32>} : memref<2x32x256xf32, #tpu.memory_space<vmem>>, vector<1x32x256xf32>,
    return
  }
  func.func @transform_0(%arg0: i32) -> (i32, i32, i32) {
    %c0_i32 = arith.constant 0 : i32
    %c0_i32_0 = arith.constant 0 : i32
    %c0_i32_1 = arith.constant 0 : i32
    return %arg0, %c0_i32, %c0_i32_0 : i32, i32, i32
  }
  func.func @transform_1(%arg0: i32) -> (i32, i32, i32) {
    %c0_i32 = arith.constant 0 : i32
    %c0_i32_0 = arith.constant 0 : i32
    %c0_i32_1 = arith.constant 0 : i32
    return %arg0, %c0_i32, %c0_i32_0 : i32, i32, i32
  }
  func.func @transform_2(%arg0: i32) -> (i32, i32) {
    %c0_i32 = arith.constant 0 : i32
    %c0_i32_0 = arith.constant 0 : i32
    %c0_i32_1 = arith.constant 0 : i32
    return %c0_i32, %c0_i32_0 : i32, i32
  }
  func.func @transform_3(%arg0: i32) -> (i32, i32) {
    %c0_i32 = arith.constant 0 : i32
    %c0_i32_0 = arith.constant 0 : i32
    %c0_i32_1 = arith.constant 0 : i32
    return %c0_i32, %c0_i32_0 : i32, i32
  }
  func.func @transform_4(%arg0: i32) -> (i32, i32) {
    %c0_i32 = arith.constant 0 : i32
    %c0_i32_0 = arith.constant 0 : i32
    %c0_i32_1 = arith.constant 0 : i32
    return %c0_i32, %c0_i32_0 : i32, i32
  }
  func.func @transform_5(%arg0: i32) -> (i32, i32) {
    %c0_i32 = arith.constant 0 : i32
    %c0_i32_0 = arith.constant 0 : i32
    %c0_i32_1 = arith.constant 0 : i32
    return %c0_i32, %c0_i32_0 : i32, i32
  }
  func.func @transform_6(%arg0: i32) -> (i32, i32) {
    %c0_i32 = arith.constant 0 : i32
    %c0_i32_0 = arith.constant 0 : i32
    %c0_i32_1 = arith.constant 0 : i32
    return %c0_i32, %c0_i32_0 : i32, i32
  }
  func.func @transform_7(%arg0: i32) -> (i32, i32, i32) {
    %c0_i32 = arith.constant 0 : i32
    %c0_i32_0 = arith.constant 0 : i32
    %c0_i32_1 = arith.constant 0 : i32
    return %arg0, %c0_i32, %c0_i32_0 : i32, i32, i32
  }
}

</mosaic_0001>

<bundles_post_ra>
// kernel: tpu_custom_call.1
= control target key start
LH: loop header
LB: loop body
LE: loop exit
PB: predicated region body
PF: predicated region fallthrough
CT: control target
= control target key end

     0   :  { %s4814_s0 = inlined_call_operand.hbm [shape: f32[4,32,256], index: 0, kind: input, shape index: {}]   ;;  %s4815_s1 = inlined_call_operand.hbm [shape: f32[4,16,256], index: 1, kind: input, shape index: {}]   ;;  %s4816_s2 = inlined_call_operand.vmem [shape: bf16[32,16], index: 2, kind: input, shape index: {}]   ;;  %s4817_s3 = inlined_call_operand.vmem [shape: bf16[32,32], index: 3, kind: input, shape index: {}]   ;;  %s4818_s4 = inlined_call_operand.vmem [shape: bf16[32,32], index: 4, kind: input, shape index: {}]   ;;  %s4819_s5 = inlined_call_operand.vmem [shape: bf16[32,32], index: 5, kind: input, shape index: {}]   ;;  %s4820_s6 = inlined_call_operand.vmem [shape: f32[32,4], index: 6, kind: input, shape index: {}]   ;;  %s4821_s7 = inlined_call_operand.hbm [shape: f32[4,32,256], index: 7, kind: output, shape index: {}]  }
   0x1   :  { %4893 = sst [smem:[#allocation54_spill]] %s4814_s0 }
   0x2   :  { %12 = vsyncpa [#allocation3], 0 }
   0x3   :  { %14 = vsyncpa [#allocation3 + $0x1], 0 }
   0x4   :  { %15 = vsyncpa [#allocation6], 0 }
   0x5   :  { %17 = vsyncpa [#allocation6 + $0x1], 0 }
   0x6   :  { %18 = vsyncpa [#allocation4], 0 }
   0x7   :  { %20 = vsyncpa [#allocation4 + $0x1], 0  ;;  %s3199_s24 = smov 0   ;;  %s3201_s25 = smov 0  }
   0x8   :  { %s3203_s26 = smov 0   ;;  %s3205_s27 = smov 0  }
   0x9 LB: > { %4894 = sst [smem:[#allocation11_spill]] %s3145_s26  ;;  %s3220_s28 = sadd.s32 4294967295, %s3149_s27   ;;  %s3149_s27 = sphi %s3205_s27, %s5070_s27   ;;  %s3145_s26 = sphi %s3203_s26, %s5072_s26   ;;  %s3141_s25 = sphi %s3201_s25, %s5074_s25   ;;  %s3137_s24 = sphi %s3199_s24, %s5073_s24  }
   0xa   : > { %4895 = sst [smem:[#allocation12_spill]] %s3149_s27  ;;  %s2473_s29 = sadd.s32 4294967294, %s3149_s27  }
   0xb   : > { %s3224_s30 = sadd.s32 1, %s3149_s27   ;;  %s33_s8 = sadd.s32 1, %s3145_s26 }
   0xc   : > { %4896 = sst [smem:[#allocation13_spill]] %s3224_s30  ;;  %s30_s9 = ssub.s32 %s3149_s27, %s3224_s30 }
   0xd   : > { %p40_p0 = scmp.ne.s32.totalorder %s3145_s26, %s3141_s25  ;;  %p31_p1 = scmp.eq.s32.totalorder %s30_s9, 0 }
   0xe   : > { %p41_p2 = scmp.eq.s32.totalorder %s3149_s27, 0  ;;  %p46_p3 = scmp.ne.s32.totalorder %s3141_s25, %s3137_s24 }
   0xf   : > { %p47_p4 = scmp.eq.s32.totalorder %s3220_s28, 0  ;;  %p201_p7 = scmp.eq.s32.totalorder %s3220_s28, 1 }
  0x10   : > { %s3236_s10 = scalar_select %p31_p1, %s3145_s26, %s33_s8  }
  0x11   : > { %p3238_p5 = por %p41_p2, %p40_p0  ;;  %p3242_p6 = por %p47_p4, %p46_p3 }
  0x12   : > { %4897 = sst [smem:[#allocation14_spill]] %s3236_s10  ;;  %p207_p8 = scmp.eq.s32.totalorder %s2473_s29, 1 }
  0x13   : > { %p2683_p10 = scmp.lt.s32.totalorder %s3149_s27, 2  ;;  %p3249_p11 = por %p201_p7, %p40_p0 }
  0x14   : > { %p3253_p12 = por %p207_p8, %p46_p3  ;;  %s3258_s15 = sand.u32 1, %s3145_s26  }
  0x15   : > { %s2651_s16 = sshll.u32 %s3149_s27, 7  ;;  %s2476_s17 = sshll.u32 %s3258_s15, 7 }
  0x16   : > { %s4901_s14 = scalar_select %p3253_p12, 1, 0 }
  0x17   : > { %s4903_s0 = sld [smem:[#allocation54_spill]]  ;;  %s246_s22 = scalar_lea.vmem [#allocation2], %s2476_s17 }
  0x18   : > { %4902 = sst [smem:[#allocation15_spill]] %s4901_s14  ;;  %s255_s23 = sshll.u32 %s246_s22, 4  ;;  %s256_s23 = int_to_ptr.vmem [resolvable:$true] %s255_s23 }
  0x19   : > { %p3267_p13 = pnand %p2683_p10, %p3238_p5  ;;  %p2484_p0 = scmp.ge.s32.totalorder %s3149_s27, 1 }
  0x1a   : > { %p286_p1 = scmp.lt.s32.totalorder %s3149_s27, 3  ;;  %s243_s8 = scalar_lea.sflag [#allocation3], %s3258_s15 }
  0x1b   : > { %p3023_p3 = pneg %p3267_p13 }
  0x1d   : > { %s252_s20 = scalar_lea.hbm %s4903_s0, %s2651_s16  ;;  %s3026_s17 = scalar_lea.hbm %s4903_s0, 256 }
  0x1e   : > { %s253_s21 = sshll.u32 %s252_s20, 4  ;;  %s254_s21 = int_to_ptr.hbm [resolvable:$true] %s253_s21 }
  0x1f   : > { %s3019_s9 = sshra.s32 %s254_s21, 4  ;;  %s3020_s9 = int_to_ptr.hbm [resolvable:$true] %s3019_s9 }
  0x20   : > { %s3021_s10 = scalar_lea.hbm %s3020_s9, 128  ;;  %p3027_p5 = scmp.lt.s32.totalorder %s3020_s9, %s4903_s0 }
  0x21   : > { %p3022_p2 = scmp.ne.s32.totalorder %s3020_s9, %s3021_s10  ;;  %p3028_p8 = scmp.lt.s32.totalorder %s3026_s17, %s3021_s10 }
  0x23   : > { %p3024_p4 = pnand %p3023_p3, %p3022_p2  ;;  %p3029_p10 = por %p3028_p8, %p3027_p5 }
  0x25   : > { %p3025_p7 = pneg %p3024_p4 }
  0x27   : > { %p3030_p9 = pnand %p3029_p10, %p3025_p7 }
  0x29   : > { %3033 = shalt.err (!%p3030_p9)
}
  0x2a   : > { %s3151_s20 = smov 256   ;;  %s3152_s22 = smov 16  }
  0x2b   : > { %2675 = dma.hbm_to_vmem [thread:$0]  (!%p3267_p13), %s254_s21, 2048, %s256_s23, %s243_s8, %s3151_s20, %s3151_s20, %s3152_s22  }
  0x2c   : > { %p3291_p2 = pnand %p2484_p0, %p286_p1  ;;  %s2480_s10 = sshll.u32 %s3258_s15, 6 }
  0x2d   : > { %s2653_s9 = sshll.u32 %s3149_s27, 6  ;;  %s269_s0 = scalar_lea.vmem [#allocation5], %s2480_s10 }
  0x2e   : > { %s275_s18 = scalar_lea.hbm %s4815_s1, %s2653_s9  ;;  %s278_s26 = sshll.u32 %s269_s0, 4  ;;  %s279_s26 = int_to_ptr.vmem [resolvable:$true] %s278_s26 }
  0x2f   : > { %s276_s19 = sshll.u32 %s275_s18, 4  ;;  %s266_s30 = scalar_lea.sflag [#allocation6], %s3258_s15  ;;  %s277_s19 = int_to_ptr.hbm [resolvable:$true] %s276_s19 }
  0x30   : > { %s3049_s14 = sshra.s32 %s277_s19, 4  ;;  %s3056_s27 = scalar_lea.hbm %s4815_s1, 128  ;;  %s3050_s14 = int_to_ptr.hbm [resolvable:$true] %s3049_s14 }
  0x31   : > { %s3051_s21 = scalar_lea.hbm %s3050_s14, 64  ;;  %p3057_p4 = scmp.lt.s32.totalorder %s3050_s14, %s4815_s1 }
  0x32   : > { %p3052_p9 = scmp.ne.s32.totalorder %s3050_s14, %s3051_s21  ;;  %p3058_p7 = scmp.lt.s32.totalorder %s3056_s27, %s3051_s21 }
  0x34   : > { %p3054_p0 = pnand %p3052_p9, %p3023_p3  ;;  %p3059_p5 = por %p3058_p7, %p3057_p4 }
  0x36   : > { %p3055_p1 = pneg %p3054_p0 }
  0x38   : > { %p3060_p8 = pnand %p3059_p5, %p3055_p1 }
  0x3a   : > { %3063 = shalt.err (!%p3060_p8)
}
  0x3b   : > { %2678 = dma.hbm_to_vmem [thread:$0]  (!%p3267_p13), %s277_s19, 1024, %s279_s26, %s266_s30, %s3151_s20, %s3151_s20, %s3152_s22  }
  0x3c   : > { %290 = sbr.rel (%p3291_p2) target bundleno = 1907 (0x773), region = 48 }
  0x41   : > { %s3315_s0 = sand.u32 1, %s3141_s25  }
  0x42   : > { %s2485_s15 = sshll.u32 %s3315_s0, 7  ;;  %s293_s10 = scalar_lea.sflag [#allocation3], %s3315_s0 }
  0x43   : > { %s3321_s27 = scalar_lea.vmem [#allocation2], %s2485_s15 }
  0x44   : > { %3124 = dma.done.wait (%p3242_p6), %s293_s10, 2048  }
  0x45   : > { %3126 = vsyncadd (%p3242_p6), %s293_s10, 4294965248  ;;  %s2486_s26 = sshll.u32 %s3315_s0, 6  ;;  %s303_s30 = scalar_lea.sflag [#allocation6], %s3315_s0 }
  0x46   : > { %s306_s14 = scalar_lea.vmem [#allocation5], %s2486_s26 }
  0x47   : > { %3128 = dma.done.wait (%p3242_p6), %s303_s30, 1024  }
  0x48   : > { %3130 = vsyncadd (%p3242_p6), %s303_s30, 4294966272  ;;  %v3153_v0 = vmov 1   ;;  %v3154_v1 = vmov 0   ;;  %v3337_v2 = vld [vmem:[%s4820_s6] sm:$0xff]  ;;  %v374_v4 = vld [vmem:[%s306_s14 + $0x10] sm:$0xff]  ;;  %vm423_vm0 = vcmask 130048  }
  0x49   : > { %2725 = vset.pattern.permute.xlu0 %v3153_v0  ;;  %2726 = vset.pattern.permute.xlu1 %v3153_v0  ;;  %v372_v3 = vld [vmem:[%s306_s14] sm:$0xff]  ;;  %v373_v6 = vld [vmem:[%s306_s14 + $0x8] sm:$0xff]  ;;  %v375_v7 = vld [vmem:[%s306_s14 + $0x18] sm:$0xff]  ;;  %vm536_vm1 = vcmask 261120   ;;  %v3155_v46 = vmov 2   ;;  %s4171_s30 = scalar_lea.vmem [#allocation7], %s2485_s15 }
  0x4a   : > { %2727 = vset.pattern.permute.xlu2 %v3154_v1  ;;  %511 = vperm.xlu0 %2725, %v3337_v2   ;;  %v381_v5 = vpack.c.bf16 %v374_v4, %v372_v3  ;;  %v2496_v8 = vld [vmem:[%s306_s14 + $0x20] sm:$0xff]  ;;  %v382_v9 = vpack.c.bf16 %v375_v7, %v373_v6  ;;  %v2498_v10 = vld [vmem:[%s306_s14 + $0x30] sm:$0xff]  ;;  %v2497_v11 = vld [vmem:[%s306_s14 + $0x28] sm:$0xff]  ;;  %s2665_s12 = sshll.u32 %s3220_s28, 7  ;;  %s2374_s18 = sshll.u32 %s4171_s30, 4  ;;  %s2375_s18 = int_to_ptr.vmem [resolvable:$true] %s2374_s18 }
  0x4b   : > { %v2499_v12 = vld [vmem:[%s306_s14 + $0x38] sm:$0xff]  ;;  %v383_v13 = vpack.c.bf16 %v2498_v10, %v2496_v8  ;;  %v2654_v15 = vld [vmem:[%s4816_s2] sm:$0xff]  ;;  %v3346_v16 = vld [vmem:[%s4820_s6 + $0x10] sm:$0xff]  ;;  %s2373_s17 = scalar_lea.hbm %s4821_s7, %s2665_s12  ;;  %s2361_s21 = scalar_lea.sflag [#allocation4], %s3315_s0 }
  0x4c   : > { %437 = vmatpush.bf16.msra.mxu0 %v381_v5  ;;  %v384_v14 = vpack.c.bf16 %v2499_v12, %v2497_v11  ;;  %456 = vmatpush.bf16.msra.mxu1 %v382_v9  ;;  %v3352_v17 = vld [vmem:[%s4820_s6 + $0x8] sm:$0xff]  ;;  %v351_v18 = vld [vmem:[%s3321_s27 + $0x20] sm:$0xff]  ;;  %v353_v19 = vld [vmem:[%s3321_s27 + $0x30] sm:$0xff]  ;;  %s2376_s19 = sshll.u32 %s2373_s17, 4  ;;  %s3099_s9 = scalar_lea.hbm %s4821_s7, 256  ;;  %s2377_s19 = int_to_ptr.hbm [resolvable:$true] %s2376_s19 }
  0x4d   : > { %519 = vperm.xlu1 %2726, %v3346_v16   ;;  %475 = vmatpush.bf16.msra.mxu2 %v383_v13  ;;  %v352_v20 = vld [vmem:[%s3321_s27 + $0x28] sm:$0xff]  ;;  %v354_v21 = vld [vmem:[%s3321_s27 + $0x38] sm:$0xff]  ;;  %v368_v22 = vpack.c.bf16 %v353_v19, %v351_v18  ;;  %v2492_v24 = vld [vmem:[%s3321_s27 + $0x60] sm:$0xff]  ;;  %s3093_s28 = sshra.s32 %s2377_s19, 4  ;;  %s3094_s28 = int_to_ptr.hbm [resolvable:$true] %s3093_s28 }
  0x4e   : > { %494 = vmatpush.bf16.msra.mxu3 %v384_v14  ;;  %v369_v23 = vpack.c.bf16 %v354_v21, %v352_v20  ;;  %v2494_v25 = vld [vmem:[%s3321_s27 + $0x70] sm:$0xff]  ;;  %v2493_v26 = vld [vmem:[%s3321_s27 + $0x68] sm:$0xff]  ;;  %405 = vperm.xlu2 %2727, %v3346_v16   ;;  %v3367_v27 = vld [vmem:[%s4820_s6 + $0x18] sm:$0xff]  ;;  %s3095_s23 = scalar_lea.hbm %s3094_s28, 128  ;;  %p3100_p10 = scmp.lt.s32.totalorder %s3094_s28, %s4821_s7 }
  0x4f   : > { %2508 = vmatmul.msk.bf16.vlgmr.msra.gmra.mxu0 %vm423_vm0, %v2654_v15  ;;  %2510 = vmatmul.msk.bf16.vlgmr.msra.gmra.mxu1 %vm423_vm0, %v2654_v15  ;;  %v370_v28 = vpack.c.bf16 %v2494_v25, %v2492_v24  ;;  %v2495_v29 = vld [vmem:[%s3321_s27 + $0x78] sm:$0xff]  ;;  %v347_v30 = vld [vmem:[%s3321_s27] sm:$0xff]  ;;  %v349_v31 = vld [vmem:[%s3321_s27 + $0x10] sm:$0xff]  ;;  %p3096_p6 = scmp.ne.s32.totalorder %s3094_s28, %s3095_s23  ;;  %p3101_p2 = scmp.lt.s32.totalorder %s3099_s9, %s3095_s23 }
  0x50   : > { %2512 = vmatmul.msk.bf16.vlgmr.msra.gmra.mxu2 %vm423_vm0, %v2654_v15  ;;  %v371_v32 = vpack.c.bf16 %v2495_v29, %v2493_v26  ;;  %v348_v33 = vld [vmem:[%s3321_s27 + $0x8] sm:$0xff]  ;;  %v350_v34 = vld [vmem:[%s3321_s27 + $0x18] sm:$0xff]  ;;  %v2488_v35 = vld [vmem:[%s3321_s27 + $0x40] sm:$0xff]  ;;  %549 = vmatpush.bf16.msrb.mxu0 %v368_v22  ;;  %v364_v36 = vpack.c.bf16 %v349_v31, %v347_v30 }
  0x51   : > { %2514 = vmatmul.msk.bf16.vlgmr.msra.gmra.mxu3 %vm423_vm0, %v2654_v15  ;;  %v2490_v37 = vld [vmem:[%s3321_s27 + $0x50] sm:$0xff]  ;;  %v2489_v38 = vld [vmem:[%s3321_s27 + $0x48] sm:$0xff]  ;;  %v2491_v39 = vld [vmem:[%s3321_s27 + $0x58] sm:$0xff]  ;;  %568 = vmatpush.bf16.msrb.mxu1 %v369_v23  ;;  %v365_v40 = vpack.c.bf16 %v350_v34, %v348_v33  ;;  %p3097_p13 = pnand %p3096_p6, %p3249_p11  ;;  %p3102_p9 = por %p3101_p2, %p3100_p10 }
  0x52   : > { %515 = vperm.xlu0 %2725, %v3352_v17   ;;  %587 = vmatpush.bf16.msrb.mxu2 %v370_v28  ;;  %v366_v41 = vpack.c.bf16 %v2490_v37, %v2488_v35  ;;  %v367_v42 = vpack.c.bf16 %v2491_v39, %v2489_v38  ;;  %v2655_v43 = vld [vmem:[%s4816_s2 + $0x8] sm:$0xff]  ;;  %v2656_v44 = vld [vmem:[%s4817_s3] sm:$0xff] }
  0x53   : > { %606 = vmatpush.bf16.msrb.mxu3 %v371_v32  ;;  %v2657_v45 = vld [vmem:[%s4817_s3 + $0x8] sm:$0xff]  ;;  %p3098_p3 = pneg %p3097_p13 }
  0x54   : > { %550 = vmatpush.bf16.msrb.mxu0 %v364_v36 }
  0x55   : > { %523 = vperm.xlu1 %2726, %v3367_v27   ;;  %569 = vmatpush.bf16.msrb.mxu1 %v365_v40  ;;  %p3103_p0 = pnand %p3102_p9, %p3098_p3 }
  0x56   : > { %588 = vmatpush.bf16.msrb.mxu2 %v366_v41  ;;  %410 = vperm.xlu2 %2727, %v3367_v27  }
  0x57   : > { %607 = vmatpush.bf16.msrb.mxu3 %v367_v42 }
  0x58   : > { %661 = vmatpush.bf16.msra.mxu0 %v368_v22 }
  0x59   : > { %680 = vmatpush.bf16.msra.mxu1 %v369_v23  ;;  %v2658_v23 = vld [vmem:[%s4818_s4] sm:$0xff] }
  0x5a   : > { %2728 = vset.pattern.permute.xlu0 %v3154_v1  ;;  %699 = vmatpush.bf16.msra.mxu2 %v370_v28 }
  0x5b   : > { %395 = vperm.xlu0 %2728, %v3337_v2   ;;  %718 = vmatpush.bf16.msra.mxu3 %v371_v32 }
  0x5c   : > { %662 = vmatpush.bf16.msra.mxu0 %v364_v36 }
  0x5d   : > { %2729 = vset.pattern.permute.xlu1 %v3154_v1  ;;  %681 = vmatpush.bf16.msra.mxu1 %v365_v40 }
  0x5e   : > { %400 = vperm.xlu1 %2729, %v3352_v17   ;;  %700 = vmatpush.bf16.msra.mxu2 %v366_v41 }
  0x5f   : > { %2509 = vmatmul.msk.bf16.gmra.mxu0 %vm423_vm0, %v2655_v43  ;;  %2511 = vmatmul.msk.bf16.gmra.mxu1 %vm423_vm0, %v2655_v43 }
  0x60   : > { %719 = vmatpush.bf16.msra.mxu3 %v367_v42  ;;  %2513 = vmatmul.msk.bf16.gmra.mxu2 %vm423_vm0, %v2655_v43 }
  0x61   : > { %2515 = vmatmul.msk.bf16.gmra.mxu3 %vm423_vm0, %v2655_v43 }
  0x63   : > { %2731 = vset.pattern.permute.xlu0 %v3155_v46 }
  0x64   : > { %628 = vperm.xlu0 %2731, %v3352_v17  }
  0x66   : > { %2730 = vset.pattern.permute.xlu1 %v3155_v46 }
  0x67   : > { %624 = vperm.xlu1 %2730, %v3337_v2  }
  0x6f   : > { %2524 = vmatmul.msk.bf16.vlgmr.msrb.gmra.mxu0 %vm536_vm1, %v2656_v44  ;;  %2526 = vmatmul.msk.bf16.vlgmr.msrb.gmra.mxu1 %vm536_vm1, %v2656_v44 }
  0x70   : > { %2528 = vmatmul.msk.bf16.vlgmr.msrb.gmra.mxu2 %vm536_vm1, %v2656_v44  ;;  %632 = vperm.xlu1 %2730, %v3346_v16  }
  0x71   : > { %2530 = vmatmul.msk.bf16.vlgmr.msrb.gmra.mxu3 %vm536_vm1, %v2656_v44  ;;  %v2659_v44 = vld [vmem:[%s4818_s4 + $0x8] sm:$0xff] }
  0x78   : > { %636 = vperm.xlu1 %2730, %v3367_v27  }
  0x7f   : > { %2525 = vmatmul.msk.bf16.gmra.mxu0 %vm536_vm1, %v2657_v45  ;;  %2527 = vmatmul.msk.bf16.gmra.mxu1 %vm536_vm1, %v2657_v45 }
  0x80   : > { %2529 = vmatmul.msk.bf16.gmra.mxu2 %vm536_vm1, %v2657_v45 }
  0x81   : > { %2531 = vmatmul.msk.bf16.gmra.mxu3 %vm536_vm1, %v2657_v45 }
  0x8f   : > { %2540 = vmatmul.msk.bf16.vlgmr.msra.gmra.mxu0 %vm536_vm1, %v2658_v23  ;;  %2542 = vmatmul.msk.bf16.vlgmr.msra.gmra.mxu1 %vm536_vm1, %v2658_v23 }
  0x90   : > { %2544 = vmatmul.msk.bf16.vlgmr.msra.gmra.mxu2 %vm536_vm1, %v2658_v23 }
  0x91   : > { %2546 = vmatmul.msk.bf16.vlgmr.msra.gmra.mxu3 %vm536_vm1, %v2658_v23 }
  0x9f   : > { %2541 = vmatmul.msk.bf16.gmra.mxu0 %vm536_vm1, %v2659_v44  ;;  %2543 = vmatmul.msk.bf16.gmra.mxu1 %vm536_vm1, %v2659_v44 }
  0xa0   : > { %2545 = vmatmul.msk.bf16.gmra.mxu2 %vm536_vm1, %v2659_v44 }
  0xa1   : > { %2547 = vmatmul.msk.bf16.gmra.mxu3 %vm536_vm1, %v2659_v44 }
  0xa8   : > { %v406_v56 = vpop.permute.xlu2 %405 }
  0xb0   : > { %v3426_v63 = vpop.permute.xlu2 %410 }
  0xb1   : > { %4911 = vst [vmem:[#allocation21_spill] sm:$0xff] %v3426_v63 }
  0xbc   : > { %v512_v50 = vpop.permute.xlu0 %511 }
  0xbf   : > { %v3411_v49 = vpop.permute.xlu1 %519 }
  0xc4   : > { %v516_v57 = vpop.permute.xlu0 %515 }
  0xc7   : > { %v3418_v55 = vpop.permute.xlu1 %523 }
  0xcc   : > { %v439_v47 = vpop.f32.mrf.mxu0  ;;  %v458_v48 = vpop.f32.mrf.mxu1 }
  0xcd   : > { %v3434_v10 = vpop.permute.xlu0 %395 }
  0xce   : > { %4914 = vst [vmem:[#allocation24_spill] sm:$0xff] %v3434_v10  ;;  %v440_v15 = vadd.f32 %v439_v47, %v3434_v10  ;;  %v459_v16 = vadd.f32 %v458_v48, %v3434_v10 }
  0xd0   : > { %v3424_v62 = vpop.permute.xlu1 %400 }
  0xd1   : > { %4910 = vst [vmem:[#allocation20_spill] sm:$0xff] %v3424_v62 }
  0xd3   : > { %v3414_v51 = vpop.f32.mrf.mxu2 }
  0xd4   : > { %4906 = vst [vmem:[#allocation16_spill] sm:$0xff] %v3414_v51  ;;  %v3416_v52 = vpop.f32.mrf.mxu3  ;;  %v441_v53 = vpop.f32.mrf.mxu0 }
  0xd5   : > { %4907 = vst [vmem:[#allocation17_spill] sm:$0xff] %v3416_v52  ;;  %v460_v54 = vpop.f32.mrf.mxu1  ;;  %v442_v11 = vadd.f32 %v441_v53, %v3424_v62 }
  0xd6   : > { %v461_v12 = vadd.f32 %v460_v54, %v3424_v62 }
  0xd7   : > { %v731_v17 = vpack.c.bf16 %v442_v11, %v440_v15 }
  0xd8   : > { %v732_v18 = vpack.c.bf16 %v461_v12, %v459_v16 }
  0xdb   : > { %v3420_v58 = vpop.f32.mrf.mxu2 }
  0xdc   : > { %4908 = vst [vmem:[#allocation18_spill] sm:$0xff] %v3420_v58  ;;  %v3422_v59 = vpop.f32.mrf.mxu3  ;;  %v444_v60 = vpop.f32.mrf.mxu0 }
  0xdd   : > { %4909 = vst [vmem:[#allocation19_spill] sm:$0xff] %v3422_v59  ;;  %v463_v61 = vpop.f32.mrf.mxu1  ;;  %v445_v6 = vadd.f32 %v444_v60, %v406_v56 }
  0xde   : > { %v464_v7 = vadd.f32 %v463_v61, %v406_v56 }
  0xe3   : > { %v482_v0 = vpop.f32.mrf.mxu2 }
  0xe4   : > { %v501_v1 = vpop.f32.mrf.mxu3  ;;  %v3428_v2 = vadd.f32 %v482_v0, %v406_v56  ;;  %v446_v4 = vpop.f32.mrf.mxu0 }
  0xe5   : > { %v3430_v3 = vadd.f32 %v501_v1, %v406_v56  ;;  %v465_v5 = vpop.f32.mrf.mxu1  ;;  %v447_v8 = vadd.f32 %v446_v4, %v3426_v63 }
  0xe6   : > { %4912 = vst [vmem:[#allocation22_spill] sm:$0xff] %v3428_v2  ;;  %v466_v9 = vadd.f32 %v465_v5, %v3426_v63 }
  0xe7   : > { %4913 = vst [vmem:[#allocation23_spill] sm:$0xff] %v3430_v3  ;;  %v733_v13 = vpack.c.bf16 %v447_v8, %v445_v6 }
  0xe8   : > { %v734_v14 = vpack.c.bf16 %v466_v9, %v464_v7 }
  0xe9   : > { %821 = vmatpush.bf16.msrb.mxu0 %v733_v13 }
  0xea   : > { %910 = vmatpush.bf16.msrb.mxu1 %v734_v14 }
  0xeb   : > { %v3440_v19 = vpop.f32.mrf.mxu2 }
  0xec   : > { %4915 = vst [vmem:[#allocation25_spill] sm:$0xff] %v3440_v19  ;;  %v3442_v20 = vpop.f32.mrf.mxu3  ;;  %v552_v21 = vpop.f32.mrf.mxu0 }
  0xed   : > { %4916 = vst [vmem:[#allocation26_spill] sm:$0xff] %v3442_v20  ;;  %v571_v22 = vpop.f32.mrf.mxu1  ;;  %822 = vmatpush.bf16.msrb.mxu0 %v731_v17  ;;  %v553_v28 = vadd.f32 %v552_v21, %v512_v50 }
  0xee   : > { %911 = vmatpush.bf16.msrb.mxu1 %v732_v18  ;;  %v572_v29 = vadd.f32 %v571_v22, %v512_v50 }
  0xf3   : > { %v590_v24 = vpop.f32.mrf.mxu2 }
  0xf4   : > { %v609_v25 = vpop.f32.mrf.mxu3  ;;  %v554_v26 = vpop.f32.mrf.mxu0  ;;  %v591_v36 = vadd.f32 %v590_v24, %v512_v50 }
  0xf5   : > { %v573_v27 = vpop.f32.mrf.mxu1  ;;  %v555_v30 = vadd.f32 %v554_v26, %v516_v57  ;;  %v610_v37 = vadd.f32 %v609_v25, %v512_v50 }
  0xf6   : > { %v574_v31 = vadd.f32 %v573_v27, %v516_v57 }
  0xf7   : > { %v735_v32 = vpack.c.bf16 %v555_v30, %v553_v28 }
  0xf8   : > { %v736_v33 = vpack.c.bf16 %v574_v31, %v572_v29 }
  0xfa   : > { %743 = vxpose.binary.xlu2.c.b16.start [1/4] (short) %v736_v33, %v735_v32, 128 }
  0xfb   : > { %v592_v34 = vpop.f32.mrf.mxu2 }
  0xfc   : > { %v611_v35 = vpop.f32.mrf.mxu3  ;;  %v593_v38 = vadd.f32 %v592_v34, %v516_v57  ;;  %v557_v40 = vpop.f32.mrf.mxu0 }
  0xfd   : > { %v612_v39 = vadd.f32 %v611_v35, %v516_v57  ;;  %v576_v41 = vpop.f32.mrf.mxu1  ;;  %v558_v50 = vadd.f32 %v557_v40, %v3411_v49 }
  0xfe   : > { %v1557_v42 = vpack.c.bf16 %v593_v38, %v591_v36  ;;  %v577_v53 = vadd.f32 %v576_v41, %v3411_v49 }
  0xff   : > { %v1558_v43 = vpack.c.bf16 %v612_v39, %v610_v37 }
 0x101   : > { %1565 = vxpose.binary.xlu0.c.b16.start [1/4] (short) %v1558_v43, %v1557_v42, 128 }
 0x103   : > { %v595_v45 = vpop.f32.mrf.mxu2 }
 0x104   : > { %v614_v46 = vpop.f32.mrf.mxu3  ;;  %v559_v47 = vpop.f32.mrf.mxu0  ;;  %v596_v1 = vadd.f32 %v595_v45, %v3411_v49 }
 0x105   : > { %v578_v48 = vpop.f32.mrf.mxu1  ;;  %v560_v54 = vadd.f32 %v559_v47, %v3418_v55  ;;  %v615_v4 = vadd.f32 %v614_v46, %v3411_v49 }
 0x106   : > { %v579_v56 = vadd.f32 %v578_v48, %v3418_v55 }
 0x107   : > { %v737_v57 = vpack.c.bf16 %v560_v54, %v558_v50 }
 0x108   : > { %v738_v60 = vpack.c.bf16 %v579_v56, %v577_v53 }
 0x10a   : > { %744 = vxpose.binary.xlu2.c.b16.end [2/4] (short) %v738_v60, %v737_v57, 128 }
 0x10b   : > { %v597_v61 = vpop.f32.mrf.mxu2 }
 0x10c   : > { %v616_v0 = vpop.f32.mrf.mxu3  ;;  %v598_v5 = vadd.f32 %v597_v61, %v3418_v55  ;;  %v3480_v22 = vpop.f32.mrf.mxu0 }
 0x10d   : > { %v617_v6 = vadd.f32 %v616_v0, %v3418_v55  ;;  %v3478_v21 = vpop.f32.mrf.mxu1  ;;  %4918 = vst [vmem:[#allocation28_spill] sm:$0xff] %v3480_v22 }
 0x10e   : > { %v1559_v7 = vpack.c.bf16 %v598_v5, %v596_v1  ;;  %4917 = vst [vmem:[#allocation27_spill] sm:$0xff] %v3478_v21 }
 0x10f   : > { %v1560_v8 = vpack.c.bf16 %v617_v6, %v615_v4 }
 0x111   : > { %1566 = vxpose.binary.xlu0.c.b16.end [2/4] (short) %v1560_v8, %v1559_v7, 128 }
 0x114   : > { %v3486_v26 = vpop.f32.mrf.mxu0 }
 0x115   : > { %v3482_v25 = vpop.f32.mrf.mxu1  ;;  %4920 = vst [vmem:[#allocation30_spill] sm:$0xff] %v3486_v26 }
 0x116   : > { %4919 = vst [vmem:[#allocation29_spill] sm:$0xff] %v3482_v25 }
 0x11c   : > { %v3490_v29 = vpop.f32.mrf.mxu0 }
 0x11d   : > { %v3488_v28 = vpop.f32.mrf.mxu1  ;;  %4922 = vst [vmem:[#allocation32_spill] sm:$0xff] %v3490_v29 }
 0x11e   : > { %4921 = vst [vmem:[#allocation31_spill] sm:$0xff] %v3488_v28 }
 0x124   : > { %v3496_v32 = vpop.f32.mrf.mxu0 }
 0x125   : > { %v3494_v31 = vpop.f32.mrf.mxu1  ;;  %4924 = vst [vmem:[#allocation34_spill] sm:$0xff] %v3496_v32 }
 0x126   : > { %4923 = vst [vmem:[#allocation33_spill] sm:$0xff] %v3494_v31 }
 0x19b   : > { %v751_v9 = vpop.trf.xlu2 }
 0x19c   : > { %2548 = vmatmul.msk.bf16.vlgmr.msrb.gmra.mxu0 %vm536_vm1, %v751_v9  ;;  %2564 = vmatmul.msk.bf16.vlgmr.msrb.gmra.mxu1 %vm536_vm1, %v751_v9 }
 0x1a3   : > { %v752_v11 = vpop.trf.xlu2 }
 0x1ab   : > { %v753_v12 = vpop.trf.xlu2 }
 0x1ac   : > { %2549 = vmatmul.msk.bf16.gmra.mxu0 %vm536_vm1, %v753_v12  ;;  %2565 = vmatmul.msk.bf16.gmra.mxu1 %vm536_vm1, %v753_v12 }
 0x1b3   : > { %v754_v13 = vpop.trf.xlu2 }
 0x1bb   : > { %v755_v49 = vpop.trf.xlu2 }
 0x1bc   : > { %2550 = vmatmul.msk.bf16.gmra.mxu0 %vm536_vm1, %v755_v49  ;;  %2566 = vmatmul.msk.bf16.gmra.mxu1 %vm536_vm1, %v755_v49 }
 0x1c3   : > { %v756_v55 = vpop.trf.xlu2 }
 0x1cb   : > { %v757_v14 = vpop.trf.xlu2 }
 0x1cc   : > { %2551 = vmatmul.msk.bf16.gmra.mxu0 %vm536_vm1, %v757_v14  ;;  %2567 = vmatmul.msk.bf16.gmra.mxu1 %vm536_vm1, %v757_v14 }
 0x1d3   : > { %v758_v15 = vpop.trf.xlu2 }
 0x1db   : > { %v759_v16 = vpop.trf.xlu2 }
 0x1dc   : > { %2552 = vmatmul.msk.bf16.gmra.mxu0 %vm536_vm1, %v759_v16  ;;  %2568 = vmatmul.msk.bf16.gmra.mxu1 %vm536_vm1, %v759_v16 }
 0x1e3   : > { %v760_v17 = vpop.trf.xlu2 }
 0x1eb   : > { %v761_v18 = vpop.trf.xlu2 }
 0x1ec   : > { %2553 = vmatmul.msk.bf16.gmra.mxu0 %vm536_vm1, %v761_v18  ;;  %2569 = vmatmul.msk.bf16.gmra.mxu1 %vm536_vm1, %v761_v18 }
 0x1f3   : > { %v762_v23 = vpop.trf.xlu2 }
 0x1fb   : > { %v763_v24 = vpop.trf.xlu2 }
 0x1fc   : > { %2554 = vmatmul.msk.bf16.gmra.mxu0 %vm536_vm1, %v763_v24  ;;  %2570 = vmatmul.msk.bf16.gmra.mxu1 %vm536_vm1, %v763_v24 }
 0x203   : > { %v764_v27 = vpop.trf.xlu2 }
 0x20b   : > { %v765_v30 = vpop.trf.xlu2 }
 0x20c   : > { %2555 = vmatmul.msk.bf16.gmra.mxu0 %vm536_vm1, %v765_v30  ;;  %2571 = vmatmul.msk.bf16.gmra.mxu1 %vm536_vm1, %v765_v30 }
 0x213   : > { %v766_v7 = vpop.trf.xlu2 }
 0x219   : > { %v3498_v33 = vpop.f32.mrf.mxu0  ;;  %v3500_v34 = vpop.f32.mrf.mxu1 }
 0x21c   : > { %2556 = vmatmul.msk.bf16.gmra.mxu0 %vm536_vm1, %v752_v11  ;;  %2572 = vmatmul.msk.bf16.gmra.mxu1 %vm536_vm1, %v752_v11 }
 0x221   : > { %v3504_v35 = vpop.f32.mrf.mxu0  ;;  %v3506_v36 = vpop.f32.mrf.mxu1 }
 0x222   : > { %4925 = vst [vmem:[#allocation35_spill] sm:$0xff] %v3506_v36 }
 0x229   : > { %v3508_v37 = vpop.f32.mrf.mxu0  ;;  %v3510_v38 = vpop.f32.mrf.mxu1 }
 0x22a   : > { %4926 = vst [vmem:[#allocation36_spill] sm:$0xff] %v3508_v37  ;;  %v993_v63 = vmax.f32 %v3498_v33, %v3508_v37 }
 0x22b   : > { %4927 = vst [vmem:[#allocation37_spill] sm:$0xff] %v3510_v38 }
 0x22c   : > { %2557 = vmatmul.msk.bf16.gmra.mxu0 %vm536_vm1, %v754_v13  ;;  %2573 = vmatmul.msk.bf16.gmra.mxu1 %vm536_vm1, %v754_v13 }
 0x231   : > { %v3514_v39 = vpop.f32.mrf.mxu0  ;;  %v3516_v40 = vpop.f32.mrf.mxu1 }
 0x232   : > { %4928 = vst [vmem:[#allocation38_spill] sm:$0xff] %v3514_v39  ;;  %v994_v31 = vmax.f32 %v3504_v35, %v3514_v39 }
 0x233   : > { %4929 = vst [vmem:[#allocation39_spill] sm:$0xff] %v3516_v40 }
 0x239   : > { %v3518_v41 = vpop.f32.mrf.mxu0  ;;  %v3520_v42 = vpop.f32.mrf.mxu1 }
 0x23a   : > { %4930 = vst [vmem:[#allocation40_spill] sm:$0xff] %v3518_v41  ;;  %v995_v28 = vmax.f32 %v993_v63, %v3518_v41 }
 0x23c   : > { %2558 = vmatmul.msk.bf16.gmra.mxu0 %vm536_vm1, %v756_v55  ;;  %2574 = vmatmul.msk.bf16.gmra.mxu1 %vm536_vm1, %v756_v55 }
 0x241   : > { %v3524_v43 = vpop.f32.mrf.mxu0  ;;  %v3526_v44 = vpop.f32.mrf.mxu1 }
 0x242   : > { %4931 = vst [vmem:[#allocation41_spill] sm:$0xff] %v3524_v43  ;;  %v996_v32 = vmax.f32 %v994_v31, %v3524_v43 }
 0x249   : > { %v3528_v45 = vpop.f32.mrf.mxu0  ;;  %v3530_v46 = vpop.f32.mrf.mxu1 }
 0x24a   : > { %4932 = vst [vmem:[#allocation42_spill] sm:$0xff] %v3528_v45  ;;  %v997_v21 = vmax.f32 %v995_v28, %v3528_v45 }
 0x24c   : > { %2559 = vmatmul.msk.bf16.gmra.mxu0 %vm536_vm1, %v758_v15  ;;  %2575 = vmatmul.msk.bf16.gmra.mxu1 %vm536_vm1, %v758_v15 }
 0x251   : > { %v3534_v47 = vpop.f32.mrf.mxu0  ;;  %v3536_v48 = vpop.f32.mrf.mxu1 }
 0x252   : > { %4933 = vst [vmem:[#allocation43_spill] sm:$0xff] %v3536_v48  ;;  %v998_v26 = vmax.f32 %v996_v32, %v3534_v47  ;;  %v1031_v32 = vmax.f32 %v3506_v36, %v3516_v40 }
 0x259   : > { %v3538_v50 = vpop.f32.mrf.mxu0  ;;  %v3540_v53 = vpop.f32.mrf.mxu1 }
 0x25a   : > { %v999_v22 = vmax.f32 %v997_v21, %v3538_v50 }
 0x25c   : > { %2560 = vmatmul.msk.bf16.gmra.mxu0 %vm536_vm1, %v760_v17  ;;  %2576 = vmatmul.msk.bf16.gmra.mxu1 %vm536_vm1, %v760_v17 }
 0x261   : > { %v3544_v54 = vpop.f32.mrf.mxu0  ;;  %v3546_v56 = vpop.f32.mrf.mxu1 }
 0x262   : > { %4934 = vst [vmem:[#allocation44_spill] sm:$0xff] %v3546_v56 }
 0x269   : > { %v3548_v57 = vpop.f32.mrf.mxu0  ;;  %v3550_v60 = vpop.f32.mrf.mxu1 }
 0x26a   : > { %v1001_v37 = vmax.f32 %v999_v22, %v3548_v57 }
 0x26c   : > { %2561 = vmatmul.msk.bf16.gmra.mxu0 %vm536_vm1, %v762_v23  ;;  %2577 = vmatmul.msk.bf16.gmra.mxu1 %vm536_vm1, %v762_v23 }
 0x271   : > { %v3554_v61 = vpop.f32.mrf.mxu0  ;;  %v3556_v0 = vpop.f32.mrf.mxu1 }
 0x272   : > { %4935 = vst [vmem:[#allocation45_spill] sm:$0xff] %v3556_v0 }
 0x279   : > { %v3558_v1 = vpop.f32.mrf.mxu0  ;;  %v3560_v4 = vpop.f32.mrf.mxu1 }
 0x27a   : > { %v1003_v63 = vmax.f32 %v1001_v37, %v3558_v1 }
 0x27c   : > { %2562 = vmatmul.msk.bf16.gmra.mxu0 %vm536_vm1, %v764_v27  ;;  %2578 = vmatmul.msk.bf16.gmra.mxu1 %vm536_vm1, %v764_v27 }
 0x281   : > { %v3564_v5 = vpop.f32.mrf.mxu0  ;;  %v3566_v6 = vpop.f32.mrf.mxu1 }
 0x282   : > { %4936 = vst [vmem:[#allocation46_spill] sm:$0xff] %v3566_v6 }
 0x289   : > { %v3568_v8 = vpop.f32.mrf.mxu0  ;;  %v3570_v9 = vpop.f32.mrf.mxu1 }
 0x28a   : > { %v1005_v41 = vmax.f32 %v1003_v63, %v3568_v8 }
 0x28c   : > { %2563 = vmatmul.msk.bf16.gmra.mxu0 %vm536_vm1, %v766_v7  ;;  %2579 = vmatmul.msk.bf16.gmra.mxu1 %vm536_vm1, %v766_v7 }
 0x291   : > { %v3574_v11 = vpop.f32.mrf.mxu0  ;;  %v3576_v12 = vpop.f32.mrf.mxu1 }
 0x299   : > { %v3578_v13 = vpop.f32.mrf.mxu0  ;;  %v3580_v49 = vpop.f32.mrf.mxu1 }
 0x29a   : > { %v1007_v21 = vmax.f32 %v1005_v41, %v3578_v13  ;;  %v1033_v41 = vmax.f32 %v1031_v32, %v3526_v44 }
 0x2a1   : > { %v3582_v55 = vpop.f32.mrf.mxu0  ;;  %v3584_v14 = vpop.f32.mrf.mxu1 }
 0x2a2   : > { %4937 = vst [vmem:[#allocation47_spill] sm:$0xff] %v3584_v14 }
 0x2a9   : > { %v3586_v15 = vpop.f32.mrf.mxu0  ;;  %v3588_v16 = vpop.f32.mrf.mxu1 }
 0x2aa   : > { %v1009_v22 = vmax.f32 %v1007_v21, %v3586_v15 }
 0x2b1   : > { %v3590_v17 = vpop.f32.mrf.mxu0  ;;  %v3592_v18 = vpop.f32.mrf.mxu1 }
 0x2b2   : > { %4938 = vst [vmem:[#allocation48_spill] sm:$0xff] %v3590_v17 }
 0x2b9   : > { %v3594_v23 = vpop.f32.mrf.mxu0  ;;  %v3596_v24 = vpop.f32.mrf.mxu1 }
 0x2ba   : > { %v1011_v37 = vmax.f32 %v1009_v22, %v3594_v23 }
 0x2c1   : > { %v3598_v27 = vpop.f32.mrf.mxu0  ;;  %v3600_v30 = vpop.f32.mrf.mxu1 }
 0x2c2   : > { %4939 = vst [vmem:[#allocation49_spill] sm:$0xff] %v3600_v30 }
 0x2c9   : > { %v3602_v7 = vpop.f32.mrf.mxu0  ;;  %v3604_v3 = vpop.f32.mrf.mxu1 }
 0x2d1   : > { %v3606_v59 = vpop.f32.mrf.mxu0  ;;  %v3608_v52 = vpop.f32.mrf.mxu1 }
 0x2d2   : > { %4940 = vst [vmem:[#allocation50_spill] sm:$0xff] %v3608_v52 }
 0x2d9   : > { %v3610_v20 = vpop.f32.mrf.mxu0  ;;  %v3612_v2 = vpop.f32.mrf.mxu1 }
 0x2da   : > { %4941 = vst [vmem:[#allocation51_spill] sm:$0xff] %v3612_v2 }
 0x2e1   : > { %v3614_v58 = vpop.f32.mrf.mxu0  ;;  %v3616_v62 = vpop.f32.mrf.mxu1 }
 0x2e2   : > { %4942 = vst [vmem:[#allocation52_spill] sm:$0xff] %v3616_v62 }
 0x2e9   : > { %v3618_v51 = vpop.f32.mrf.mxu0  ;;  %v3620_v10 = vpop.f32.mrf.mxu1 }
 0x2ea   : > { %4943 = vst [vmem:[#allocation53_spill] sm:$0xff] %v3620_v10  ;;  %v1000_v10 = vmax.f32 %v998_v26, %v3544_v54 }
 0x2ec   : > { %v1002_v39 = vmax.f32 %v1000_v10, %v3554_v61 }
 0x2ee   : > { %v1004_v31 = vmax.f32 %v1002_v39, %v3564_v5 }
 0x2f0   : > { %v1006_v28 = vmax.f32 %v1004_v31, %v3574_v11  ;;  %v1030_v31 = vmax.f32 %v3500_v34, %v3510_v38 }
 0x2f1   : > { %v3622_v19 = vpop.f32.mrf.mxu0  ;;  %v3630_v29 = vpop.f32.mrf.mxu1 }
 0x2f2   : > { %v1008_v26 = vmax.f32 %v1006_v28, %v3582_v55  ;;  %v1013_v28 = vmax.f32 %v1011_v37, %v3602_v7 }
 0x2f4   : > { %v1010_v10 = vmax.f32 %v1008_v26, %v3590_v17  ;;  %v1032_v26 = vmax.f32 %v1030_v31, %v3520_v42  ;;  %v1035_v17 = vmax.f32 %v1033_v41, %v3536_v48  ;;  %v1015_v40 = vmax.f32 %v1013_v28, %v3610_v20 }
 0x2f6   : > { %v1012_v39 = vmax.f32 %v1010_v10, %v3598_v27  ;;  %v1034_v36 = vmax.f32 %v1032_v26, %v3530_v46  ;;  %v1037_v38 = vmax.f32 %v1035_v17, %v3546_v56  ;;  %v1017_v32 = vmax.f32 %v1015_v40, %v3618_v51 }
 0x2f8   : > { %v1014_v21 = vmax.f32 %v1012_v39, %v3606_v59  ;;  %v1036_v39 = vmax.f32 %v1034_v36, %v3540_v53  ;;  %v1039_v31 = vmax.f32 %v1037_v38, %v3556_v0 }
 0x2f9   : > { %v3632_v25 = vpop.f32.mrf.mxu0  ;;  %v3646_v45 = vpop.f32.mrf.mxu1 }
 0x2fa   : > { %v1016_v22 = vmax.f32 %v1014_v21, %v3614_v58  ;;  %v1019_v41 = vmax.f32 %v1017_v32, %v3632_v25  ;;  %v1038_v21 = vmax.f32 %v1036_v39, %v3550_v60  ;;  %v1041_v26 = vmax.f32 %v1039_v31, %v3566_v6 }
 0x2fc   : > { %v1018_v37 = vmax.f32 %v1016_v22, %v3622_v19  ;;  %v1040_v22 = vmax.f32 %v1038_v21, %v3560_v4  ;;  %v1043_v36 = vmax.f32 %v1041_v26, %v3576_v12 }
 0x2fe   : > { %v1042_v38 = vmax.f32 %v1040_v22, %v3570_v9  ;;  %v1045_v32 = vmax.f32 %v1043_v36, %v3584_v14 }
 0x300   : > { %v1044_v39 = vmax.f32 %v1042_v38, %v3580_v49  ;;  %v1047_v31 = vmax.f32 %v1045_v32, %v3592_v18 }
 0x301   : > { %v3642_v43 = vpop.f32.mrf.mxu0  ;;  %v3667_v10 = vpop.f32.mrf.mxu1 }
 0x302   : > { %v1020_v28 = vmax.f32 %v1018_v37, %v3642_v43 }
 0x309   : > { %v3656_v63 = vpop.f32.mrf.mxu0  ;;  %v3687_v0 = vpop.f32.mrf.mxu1 }
 0x30a   : > { %v1021_v17 = vmax.f32 %v1019_v41, %v3656_v63  ;;  %v1046_v41 = vmax.f32 %v1044_v39, %v3588_v16 }
 0x30c   : > { %v1048_v26 = vmax.f32 %v1046_v41, %v3596_v24 }
 0x30e   : > { %v1050_v22 = vmax.f32 %v1048_v26, %v3604_v3 }
 0x310   : > { %v1052_v38 = vmax.f32 %v1050_v22, %v3612_v2  ;;  %v4949_v2 = vld [vmem:[#allocation42_spill] sm:$0xff] }
 0x311   : > { %v3677_v48 = vpop.f32.mrf.mxu0 }
 0x312   : > { %v1022_v40 = vmax.f32 %v1020_v28, %v3677_v48  ;;  %v1049_v28 = vmax.f32 %v1047_v31, %v3600_v30 }
 0x314   : > { %v1023_v56 = vmax.f32 %v1021_v17, %v1022_v40  ;;  %v1051_v17 = vmax.f32 %v1049_v28, %v3608_v52 }
 0x316   : > { %v1024_v37 = vrot.slane %v1023_v56, 4  ;;  %v1053_v36 = vmax.f32 %v1051_v17, %v3616_v62  ;;  %v4945_v17 = vld [vmem:[#allocation36_spill] sm:$0xff] }
 0x318   : > { %v1025_v6 = vmax.f32 %v1023_v56, %v1024_v37  ;;  %v1055_v32 = vmax.f32 %v1053_v36, %v3630_v29  ;;  %v3699_v56 = vpop.f32.mrf.mxu1  ;;  %v4944_v37 = vld [vmem:[#allocation53_spill] sm:$0xff] }
 0x319   : > { %v1054_v39 = vmax.f32 %v1052_v38, %v4944_v37  ;;  %v4946_v38 = vld [vmem:[#allocation38_spill] sm:$0xff] }
 0x31a   : > { %v1026_v21 = vrot.slane %v1025_v6, 2  ;;  %v1057_v31 = vmax.f32 %v1055_v32, %v3667_v10 }
 0x31b   : > { %v1056_v41 = vmax.f32 %v1054_v39, %v3646_v45  ;;  %v4947_v39 = vld [vmem:[#allocation40_spill] sm:$0xff] }
 0x31c   : > { %v1027_v40 = vmax.f32 %v1025_v6, %v1026_v21  ;;  %v1059_v6 = vmax.f32 %v1057_v31, %v3699_v56 }
 0x31d   : > { %v1058_v28 = vmax.f32 %v1056_v41, %v3687_v0 }
 0x31e   : > { %v1028_v14 = vrot.slane %v1027_v40, 1 }
 0x31f   : > { %v1060_v36 = vmax.f32 %v1058_v28, %v1059_v6 }
 0x320   : > { %v3703_v30 = vmax.f32 %v1027_v40, %v1028_v14 }
 0x321   : > { %v1061_v41 = vrot.slane %v1060_v36, 4 }
 0x322   : > { %v1067_v21 = vsub.f32 %v3498_v33, %v3703_v30  ;;  %v1069_v26 = vsub.f32 %v3504_v35, %v3703_v30  ;;  %v1071_v22 = vsub.f32 %v4945_v17, %v3703_v30  ;;  %v1073_v14 = vsub.f32 %v4946_v38, %v3703_v30  ;;  %v4948_v33 = vld [vmem:[#allocation41_spill] sm:$0xff] }
 0x323   : > { %v1075_v31 = vsub.f32 %v4947_v39, %v3703_v30  ;;  %v1077_v62 = vsub.f32 %v4948_v33, %v3703_v30  ;;  %v1079_v17 = vsub.f32 %v4949_v2, %v3703_v30  ;;  %v1062_v28 = vmax.f32 %v1060_v36, %v1061_v41 }
 0x324   : > { %v1131_v40 = vmul.f32 1.442695, %v1067_v21  ;;  %v1135_v32 = vmul.f32 1.442695, %v1069_v26  ;;  %v1139_v52 = vmul.f32 1.442695, %v1071_v22  ;;  %v1081_v21 = vsub.f32 %v3534_v47, %v3703_v30 }
 0x325   : > { %v1143_v35 = vmul.f32 1.442695, %v1073_v14  ;;  %v1147_v6 = vmul.f32 1.442695, %v1075_v31  ;;  %v1151_v26 = vmul.f32 1.442695, %v1077_v62  ;;  %v1083_v22 = vsub.f32 %v3538_v50, %v3703_v30 }
 0x326   : > { %2735 = vpow2.f32 %v1131_v40  ;;  %v1085_v14 = vsub.f32 %v3544_v54, %v3703_v30  ;;  %v1155_v2 = vmul.f32 1.442695, %v1079_v17  ;;  %v1063_v36 = vrot.slane %v1062_v28, 2 }
 0x327   : > { %2737 = vpow2.f32 %v1135_v32  ;;  %v1089_v32 = vsub.f32 %v3554_v61, %v3703_v30  ;;  %v1159_v50 = vmul.f32 1.442695, %v1081_v21  ;;  %v1091_v39 = vsub.f32 %v3558_v1, %v3703_v30 }
 0x328   : > { %2739 = vpow2.f32 %v1139_v52  ;;  %v1087_v52 = vsub.f32 %v3548_v57, %v3703_v30  ;;  %v1163_v54 = vmul.f32 1.442695, %v1083_v22  ;;  %v1093_v57 = vsub.f32 %v3564_v5, %v3703_v30 }
 0x329   : > { %2741 = vpow2.f32 %v1143_v35  ;;  %v1167_v33 = vmul.f32 1.442695, %v1085_v14  ;;  %v1095_v35 = vsub.f32 %v3568_v8, %v3703_v30  ;;  %v1097_v1 = vsub.f32 %v3574_v11, %v3703_v30 }
 0x32a   : > { %2743 = vpow2.f32 %v1147_v6  ;;  %v1171_v17 = vmul.f32 1.442695, %v1087_v52  ;;  %v1064_v6 = vmax.f32 %v1062_v28, %v1063_v36  ;;  %v1099_v22 = vsub.f32 %v3578_v13, %v3703_v30 }
 0x32b   : > { %2745 = vpow2.f32 %v1151_v26  ;;  %v1175_v26 = vmul.f32 1.442695, %v1089_v32  ;;  %v1179_v5 = vmul.f32 1.442695, %v1091_v39  ;;  %v1101_v8 = vsub.f32 %v3582_v55, %v3703_v30  ;;  %v4951_v32 = vld [vmem:[#allocation48_spill] sm:$0xff] }
 0x32c   : > { %v3724_v38 = vpop.eup %2735  ;;  %2747 = vpow2.f32 %v1155_v2  ;;  %v1103_v28 = vsub.f32 %v3586_v15, %v3703_v30  ;;  %v1183_v52 = vmul.f32 1.442695, %v1093_v57  ;;  %v1187_v11 = vmul.f32 1.442695, %v1095_v35 }
 0x32d   : > { %v3728_v40 = vpop.eup %2737  ;;  %2749 = vpow2.f32 %v1159_v50  ;;  %v1065_v36 = vrot.slane %v1064_v6, 1  ;;  %v1105_v50 = vsub.f32 %v4951_v32, %v3703_v30  ;;  %v1191_v39 = vmul.f32 1.442695, %v1097_v1 }
 0x32e   : > { %4950 = vst [vmem:[#allocation53_spill] sm:$0xff] %v3728_v40  ;;  %v1259_v47 = vadd.f32 %v3728_v40, %v3724_v38  ;;  %v3736_v62 = vpop.eup %2739  ;;  %2751 = vpow2.f32 %v1163_v54  ;;  %v1107_v55 = vsub.f32 %v3594_v23, %v3703_v30  ;;  %v1195_v54 = vmul.f32 1.442695, %v1099_v22  ;;  %v3866_v40 = vpop.permute.xlu0 %628 }
 0x32f   : > { %v3743_v41 = vpop.eup %2741  ;;  %2753 = vpow2.f32 %v1167_v33  ;;  %v1109_v57 = vsub.f32 %v3598_v27, %v3703_v30  ;;  %v1111_v33 = vsub.f32 %v3602_v7, %v3703_v30  ;;  %v1199_v35 = vmul.f32 1.442695, %v1101_v8  ;;  %4959 = vst [vmem:[#allocation40_spill] sm:$0xff] %v3866_v40 }
 0x330   : > { %v1260_v31 = vadd.f32 %v3736_v62, %v1259_v47  ;;  %v3750_v21 = vpop.eup %2743  ;;  %2755 = vpow2.f32 %v1171_v17  ;;  %v3780_v1 = vmax.f32 %v1064_v6, %v1065_v36  ;;  %v1123_v22 = vsub.f32 %v3632_v25, %v3703_v30 }
 0x331   : > { %v3757_v2 = vpop.eup %2745  ;;  %2757 = vpow2.f32 %v1175_v26  ;;  %v1207_v27 = vmul.f32 1.442695, %v1105_v50  ;;  %v1127_v7 = vsub.f32 %v3656_v63, %v3703_v30  ;;  %v1129_v6 = vsub.f32 %v3677_v48, %v3703_v30  ;;  %v4952_v50 = vld [vmem:[#allocation35_spill] sm:$0xff] }
 0x332   : > { %v1261_v61 = vadd.f32 %v3743_v41, %v1260_v31  ;;  %v3764_v13 = vpop.eup %2747  ;;  %2759 = vpow2.f32 %v1179_v5  ;;  %v1219_v25 = vmul.f32 1.442695, %v1111_v33  ;;  %v1068_v63 = vsub.f32 %v3500_v34, %v3780_v1  ;;  %v4953_v33 = vld [vmem:[#allocation37_spill] sm:$0xff] }
 0x333   : > { %v3771_v31 = vpop.eup %2749  ;;  %2761 = vpow2.f32 %v1183_v52  ;;  %v1215_v52 = vmul.f32 1.442695, %v1109_v57  ;;  %v1243_v32 = vmul.f32 1.442695, %v1123_v22  ;;  %v1125_v48 = vsub.f32 %v3642_v43, %v3703_v30 }
 0x334   : > { %v1262_v14 = vadd.f32 %v3750_v21, %v1261_v61  ;;  %v3777_v17 = vpop.eup %2751  ;;  %2763 = vpow2.f32 %v1187_v11  ;;  %v1203_v61 = vmul.f32 1.442695, %v1103_v28  ;;  %v1255_v34 = vmul.f32 1.442695, %v1129_v6 }
 0x335   : > { %v3782_v26 = vpop.eup %2753  ;;  %2765 = vpow2.f32 %v1191_v39  ;;  %v1070_v39 = vsub.f32 %v4952_v50, %v3780_v1  ;;  %v1133_v43 = vmul.f32 1.442695, %v1068_v63  ;;  %v1076_v63 = vsub.f32 %v3520_v42, %v3780_v1  ;;  %v3842_v42 = vpop.permute.xlu1 %624 }
 0x336   : > { %v1263_v47 = vadd.f32 %v3757_v2, %v1262_v14  ;;  %v3786_v5 = vpop.eup %2755  ;;  %2767 = vpow2.f32 %v1195_v54  ;;  %v1211_v14 = vmul.f32 1.442695, %v1107_v55  ;;  %v1251_v54 = vmul.f32 1.442695, %v1127_v7  ;;  %v4954_v7 = vld [vmem:[#allocation39_spill] sm:$0xff]  ;;  %4955 = vst [vmem:[#allocation36_spill] sm:$0xff] %v3842_v42 }
 0x337   : > { %v3791_v28 = vpop.eup %2757  ;;  %2769 = vpow2.f32 %v1199_v35  ;;  %v1072_v35 = vsub.f32 %v4953_v33, %v3780_v1 }
 0x338   : > { %v1264_v15 = vadd.f32 %v3764_v13, %v1263_v47  ;;  %v3795_v11 = vpop.eup %2759  ;;  %2771 = vpow2.f32 %v1203_v61 }
 0x339   : > { %v3800_v36 = vpop.eup %2761  ;;  %2773 = vpow2.f32 %v1207_v27 }
 0x33a   : > { %v1265_v23 = vadd.f32 %v3771_v31, %v1264_v15  ;;  %v3804_v55 = vpop.eup %2763  ;;  %2775 = vpow2.f32 %v1211_v14  ;;  %v1074_v14 = vsub.f32 %v4954_v7, %v3780_v1 }
 0x33b   : > { %v3809_v57 = vpop.eup %2765  ;;  %2777 = vpow2.f32 %v1215_v52  ;;  %v1121_v52 = vsub.f32 %v3622_v19, %v3703_v30 }
 0x33c   : > { %v1266_v8 = vadd.f32 %v3777_v17, %v1265_v23  ;;  %v3813_v61 = vpop.eup %2767  ;;  %v1119_v23 = vsub.f32 %v3618_v51, %v3703_v30  ;;  %2779 = vpow2.f32 %v1219_v25 }
 0x33d   : > { %v3818_v27 = vpop.eup %2769  ;;  %2781 = vpow2.f32 %v1243_v32  ;;  %v1141_v32 = vmul.f32 1.442695, %v1072_v35  ;;  %v1117_v35 = vsub.f32 %v3614_v58, %v3703_v30 }
 0x33e   : > { %v1267_v47 = vadd.f32 %v3782_v26, %v1266_v8  ;;  %v1137_v8 = vmul.f32 1.442695, %v1070_v39  ;;  %v3822_v6 = vpop.eup %2771  ;;  %2783 = vpow2.f32 %v1251_v54  ;;  %v1115_v39 = vsub.f32 %v3610_v20, %v3703_v30 }
 0x33f   : > { %v3827_v25 = vpop.eup %2773  ;;  %2785 = vpow2.f32 %v1255_v34  ;;  %v1145_v54 = vmul.f32 1.442695, %v1074_v14  ;;  %v1113_v14 = vsub.f32 %v3606_v59, %v3703_v30  ;;  %v1231_v59 = vmul.f32 1.442695, %v1117_v35 }
 0x340   : > { %v1268_v15 = vadd.f32 %v3786_v5, %v1267_v47  ;;  %v1247_v47 = vmul.f32 1.442695, %v1125_v48  ;;  %v3831_v50 = vpop.eup %2775  ;;  %2787 = vpow2.f32 %v1133_v43  ;;  %v1078_v48 = vsub.f32 %v3526_v44, %v3780_v1 }
 0x341   : > { %v3836_v19 = vpop.eup %2777  ;;  %2789 = vpow2.f32 %v1137_v8  ;;  %v1080_v43 = vsub.f32 %v3530_v46, %v3780_v1  ;;  %v1149_v44 = vmul.f32 1.442695, %v1076_v63  ;;  %v1227_v8 = vmul.f32 1.442695, %v1115_v39 }
 0x342   : > { %v1269_v22 = vadd.f32 %v3791_v28, %v1268_v15  ;;  %v1235_v15 = vmul.f32 1.442695, %v1119_v23  ;;  %v3840_v34 = vpop.eup %2779  ;;  %2791 = vpow2.f32 %v1247_v47  ;;  %v4956_v47 = vld [vmem:[#allocation28_spill] sm:$0xff]  ;;  %v1153_v63 = vmul.f32 1.442695, %v1078_v48 }
 0x343   : > { %v3847_v23 = vpop.eup %2781  ;;  %2793 = vpow2.f32 %v1141_v32  ;;  %v1347_v39 = vpack.c.bf16 %v3809_v57, %v3804_v55 }
 0x344   : > { %v1270_v51 = vadd.f32 %v3795_v11, %v1269_v22  ;;  %v1239_v22 = vmul.f32 1.442695, %v1121_v52  ;;  %v3851_v7 = vpop.eup %2783  ;;  %2795 = vpow2.f32 %v1235_v15 }
 0x345   : > { %v3856_v52 = vpop.eup %2785  ;;  %2797 = vpow2.f32 %v1145_v54  ;;  %1365 = vmatpush.bf16.msrb.mxu2 %v1347_v39  ;;  %v1345_v39 = vpack.c.bf16 %v3800_v36, %v3795_v11 }
 0x346   : > { %v1271_v33 = vadd.f32 %v3800_v36, %v1270_v51  ;;  %v3860_v51 = vadd.f32 %v4956_v47, %v3842_v42  ;;  %v3864_v32 = vpop.eup %2787  ;;  %2799 = vpow2.f32 %v1239_v22  ;;  %v1157_v47 = vmul.f32 1.442695, %v1080_v43  ;;  %v4963_v43 = vld [vmem:[#allocation44_spill] sm:$0xff] }
 0x347   : > { %4958 = vst [vmem:[#allocation38_spill] sm:$0xff] %v3864_v32  ;;  %v3871_v15 = vpop.eup %2789  ;;  %2801 = vpow2.f32 %v1149_v44  ;;  %v1363_v48 = vpack.c.bf16 %v3856_v52, %v3851_v7  ;;  %v1086_v44 = vsub.f32 %v4963_v43, %v3780_v1 }
 0x348   : > { %v1272_v20 = vadd.f32 %v3804_v55, %v1271_v33  ;;  %v4957_v33 = vld [vmem:[#allocation43_spill] sm:$0xff]  ;;  %4960 = vst [vmem:[#allocation41_spill] sm:$0xff] %v3871_v15  ;;  %v3877_v54 = vpop.eup %2791  ;;  %2803 = vpow2.f32 %v1227_v8  ;;  %v1296_v22 = vadd.f32 %v3871_v15, %v3864_v32 }
 0x349   : > { %v1082_v46 = vsub.f32 %v4957_v33, %v3780_v1  ;;  %v1223_v33 = vmul.f32 1.442695, %v1113_v14  ;;  %v3882_v55 = vpop.eup %2793  ;;  %2805 = vpow2.f32 %v1153_v63  ;;  %1384 = vmatpush.bf16.msrb.mxu3 %v1363_v48  ;;  %1366 = vmatpush.bf16.msrb.mxu2 %v1345_v39  ;;  %v1169_v32 = vmul.f32 1.442695, %v1086_v44 }
 0x34a   : > { %v1273_v58 = vadd.f32 %v3809_v57, %v1272_v20  ;;  %v1084_v20 = vsub.f32 %v3540_v53, %v3780_v1  ;;  %4961 = vst [vmem:[#allocation42_spill] sm:$0xff] %v3882_v55  ;;  %v4962_v57 = vld [vmem:[#allocation30_spill] sm:$0xff]  ;;  %v3890_v14 = vpop.eup %2795  ;;  %2807 = vpow2.f32 %v1231_v59  ;;  %v4965_v59 = vld [vmem:[#allocation27_spill] sm:$0xff]  ;;  %v1343_v39 = vpack.c.bf16 %v3791_v28, %v3786_v5 }
 0x34b   : > { %v3886_v53 = vadd.f32 %v4962_v57, %v3866_v40  ;;  %v3896_v15 = vpop.eup %2797  ;;  %v1088_v57 = vsub.f32 %v3550_v60, %v3780_v1  ;;  %2809 = vpow2.f32 %v1157_v47  ;;  %v3906_v48 = vadd.f32 %v4965_v59, %v3842_v42  ;;  %v4966_v60 = vld [vmem:[#allocation29_spill] sm:$0xff] }
 0x34c   : > { %v1274_v30 = vadd.f32 %v3813_v61, %v1273_v58  ;;  %v1161_v58 = vmul.f32 1.442695, %v1082_v46  ;;  %4964 = vst [vmem:[#allocation48_spill] sm:$0xff] %v3896_v15  ;;  %v1165_v43 = vmul.f32 1.442695, %v1084_v20  ;;  %v1361_v46 = vpack.c.bf16 %v3877_v54, %v3847_v23  ;;  %v3902_v63 = vpop.eup %2799  ;;  %v4967_v47 = vld [vmem:[#allocation45_spill] sm:$0xff] }
 0x34d   : > { %2811 = vpow2.f32 %v1223_v33  ;;  %v3910_v36 = vpop.eup %2801  ;;  %v3914_v20 = vadd.f32 %v4966_v60, %v3866_v40  ;;  %v4968_v60 = vld [vmem:[#allocation46_spill] sm:$0xff]  ;;  %v1359_v44 = vpack.c.bf16 %v3902_v63, %v3890_v14  ;;  %1367 = vmatpush.bf16.msrb.mxu2 %v1343_v39  ;;  %v1341_v39 = vpack.c.bf16 %v3782_v26, %v3777_v17 }
 0x34e   : > { %v1275_v35 = vadd.f32 %v3818_v27, %v1274_v30  ;;  %v1297_v30 = vadd.f32 %v3882_v55, %v1296_v22  ;;  %v1090_v22 = vsub.f32 %v4967_v47, %v3780_v1  ;;  %2813 = vpow2.f32 %v1161_v58  ;;  %1385 = vmatpush.bf16.msrb.mxu3 %v1361_v46  ;;  %v2804_v59 = vpop.eup %2803 }
 0x34f   : > { %v3924_v42 = vpop.eup %2805  ;;  %v1094_v40 = vsub.f32 %v4968_v60, %v3780_v1  ;;  %2815 = vpow2.f32 %v1165_v43  ;;  %v1173_v58 = vmul.f32 1.442695, %v1088_v57  ;;  %v1100_v57 = vsub.f32 %v3580_v49, %v3780_v1  ;;  %v4969_v43 = vld [vmem:[#allocation47_spill] sm:$0xff] }
 0x350   : > { %v1276_v8 = vadd.f32 %v3822_v6, %v1275_v35  ;;  %v1298_v11 = vadd.f32 %v3896_v15, %v1297_v30  ;;  %v2808_v46 = vpop.eup %2807  ;;  %v1102_v47 = vsub.f32 %v4969_v43, %v3780_v1  ;;  %2817 = vpow2.f32 %v1169_v32  ;;  %v4970_v43 = vld [vmem:[#allocation49_spill] sm:$0xff] }
 0x351   : > { %v3936_v28 = vpop.eup %2809  ;;  %v1177_v60 = vmul.f32 1.442695, %v1090_v22  ;;  %v1106_v49 = vsub.f32 %v3592_v18, %v3780_v1  ;;  %2819 = vpow2.f32 %v1173_v58  ;;  %v1357_v22 = vpack.c.bf16 %v2808_v46, %v2804_v59  ;;  %1368 = vmatpush.bf16.msrb.mxu2 %v1341_v39 }
 0x352   : > { %v1277_v35 = vadd.f32 %v3827_v25, %v1276_v8  ;;  %v1092_v8 = vsub.f32 %v3560_v4, %v3780_v1  ;;  %v1299_v30 = vadd.f32 %v3910_v36, %v1298_v11  ;;  %v1096_v4 = vsub.f32 %v3570_v9, %v3780_v1  ;;  %1386 = vmatpush.bf16.msrb.mxu3 %v1359_v44 }
 0x353   : > { %v1098_v11 = vsub.f32 %v3576_v12, %v3780_v1  ;;  %v1104_v12 = vsub.f32 %v3588_v16, %v3780_v1  ;;  %v1128_v18 = vsub.f32 %v3687_v0, %v3780_v1  ;;  %2821 = vpow2.f32 %v1177_v60 }
 0x354   : > { %v1278_v33 = vadd.f32 %v3831_v50, %v1277_v35  ;;  %v1300_v5 = vadd.f32 %v3924_v42, %v1299_v30  ;;  %v1181_v32 = vmul.f32 1.442695, %v1092_v8  ;;  %v1185_v26 = vmul.f32 1.442695, %v1094_v40 }
 0x355   : > { %v1189_v58 = vmul.f32 1.442695, %v1096_v4  ;;  %v1339_v16 = vpack.c.bf16 %v3771_v31, %v3764_v13  ;;  %v1130_v39 = vsub.f32 %v3699_v56, %v3780_v1  ;;  %v1193_v17 = vmul.f32 1.442695, %v1098_v11 }
 0x356   : > { %v1279_v35 = vadd.f32 %v3836_v19, %v1278_v33  ;;  %v2812_v33 = vpop.eup %2811  ;;  %v1301_v30 = vadd.f32 %v3936_v28, %v1300_v5  ;;  %1387 = vmatpush.bf16.msrb.mxu3 %v1357_v22  ;;  %2823 = vpow2.f32 %v1181_v32  ;;  %v1124_v40 = vsub.f32 %v3646_v45, %v3780_v1 }
 0x357   : > { %v3948_v15 = vpop.eup %2813  ;;  %1369 = vmatpush.bf16.msrb.mxu2 %v1339_v16  ;;  %v1126_v13 = vsub.f32 %v3667_v10, %v3780_v1  ;;  %2825 = vpow2.f32 %v1185_v26  ;;  %v1201_v31 = vmul.f32 1.442695, %v1102_v47  ;;  %v1253_v56 = vmul.f32 1.442695, %v1128_v18 }
 0x358   : > { %v1280_v9 = vadd.f32 %v3840_v34, %v1279_v35  ;;  %v1302_v5 = vadd.f32 %v3948_v15, %v1301_v30  ;;  %v3957_v55 = vpop.eup %2815  ;;  %v1355_v35 = vpack.c.bf16 %v2812_v33, %v3840_v34  ;;  %2827 = vpow2.f32 %v1189_v58 }
 0x359   : > { %v3966_v30 = vpop.eup %2817  ;;  %v1337_v45 = vpack.c.bf16 %v3757_v2, %v3750_v21  ;;  %2829 = vpow2.f32 %v1193_v17  ;;  %v1353_v10 = vpack.c.bf16 %v3836_v19, %v3831_v50  ;;  %v1122_v21 = vsub.f32 %v3630_v29, %v3780_v1 }
 0x35a   : > { %v1281_v44 = vadd.f32 %v2812_v33, %v1280_v9  ;;  %v1303_v9 = vadd.f32 %v3957_v55, %v1302_v5  ;;  %v3974_v60 = vpop.eup %2819  ;;  %1388 = vmatpush.bf16.msrb.mxu3 %v1355_v35  ;;  %v1257_v33 = vmul.f32 1.442695, %v1130_v39  ;;  %v1205_v2 = vmul.f32 1.442695, %v1104_v12  ;;  %v4971_v35 = vld [vmem:[#allocation51_spill] sm:$0xff] }
 0x35b   : > { %1370 = vmatpush.bf16.msrb.mxu2 %v1337_v45  ;;  %v1335_v19 = vpack.c.bf16 %v3743_v41, %v3736_v62  ;;  %v1116_v16 = vsub.f32 %v4971_v35, %v3780_v1  ;;  %v1209_v5 = vmul.f32 1.442695, %v1106_v49  ;;  %v1351_v29 = vpack.c.bf16 %v3827_v25, %v3822_v6 }
 0x35c   : > { %v1282_v8 = vadd.f32 %v2804_v59, %v1281_v44  ;;  %v1197_v59 = vmul.f32 1.442695, %v1100_v57  ;;  %v1304_v4 = vadd.f32 %v3966_v30, %v1303_v9  ;;  %v1120_v57 = vsub.f32 %v4944_v37, %v3780_v1 }
 0x35d   : > { %v1249_v37 = vmul.f32 1.442695, %v1126_v13  ;;  %v4973_v41 = vsub.f32 %v3596_v24, %v3780_v1  ;;  %v1241_v49 = vmul.f32 1.442695, %v1122_v21 }
 0x35e   : > { %v1283_v0 = vadd.f32 %v2808_v46, %v1282_v8  ;;  %v1305_v34 = vadd.f32 %v3974_v60, %v1304_v4  ;;  %v3982_v46 = vpop.eup %2821  ;;  %2831 = vpow2.f32 %v1197_v59  ;;  %1389 = vmatpush.bf16.msrb.mxu3 %v1353_v10  ;;  %v1237_v18 = vmul.f32 1.442695, %v1120_v57  ;;  %v4972_v8 = vld [vmem:[#allocation52_spill] sm:$0xff] }
 0x35f   : > { %v3990_v22 = vpop.eup %2823  ;;  %2833 = vpow2.f32 %v1201_v31  ;;  %1371 = vmatpush.bf16.msrb.mxu2 %v1335_v19  ;;  %v1118_v62 = vsub.f32 %v4972_v8, %v3780_v1  ;;  %v1213_v58 = vmul.f32 1.442695, %v4973_v41  ;;  %v1229_v59 = vmul.f32 1.442695, %v1116_v16  ;;  %v4022_v31 = vpop.permute.xlu1 %632  ;;  %v4982_v41 = vld [vmem:[#allocation31_spill] sm:$0xff] }
 0x360   : > { %v1284_v11 = vadd.f32 %v3890_v14, %v1283_v0  ;;  %v1245_v14 = vmul.f32 1.442695, %v1124_v40  ;;  %v1306_v32 = vadd.f32 %v3982_v46, %v1305_v34  ;;  %2835 = vpow2.f32 %v1253_v56  ;;  %4976 = vst [vmem:[#allocation35_spill] sm:$0xff] %v4022_v31  ;;  %v4977_v34 = vld [vmem:[#allocation50_spill] sm:$0xff] }
 0x361   : > { %2837 = vpow2.f32 %v1257_v33  ;;  %v4975_v40 = vsub.f32 %v4970_v43, %v3780_v1  ;;  %v1349_v4 = vpack.c.bf16 %v3818_v27, %v3813_v61  ;;  %v4031_v43 = vpack.c.bf16 %v3886_v53, %v3860_v51 }
 0x362   : > { %v1285_v47 = vadd.f32 %v3902_v63, %v1284_v11  ;;  %v1307_v50 = vadd.f32 %v3990_v22, %v1306_v32  ;;  %v2826_v63 = vpop.eup %2825  ;;  %2839 = vpow2.f32 %v1245_v14  ;;  %1390 = vmatpush.bf16.msrb.mxu3 %v1351_v29  ;;  %v1114_v61 = vsub.f32 %v4977_v34, %v3780_v1  ;;  %v4984_v34 = vld [vmem:[#allocation42_spill] sm:$0xff] }
 0x363   : > { %v2828_v12 = vpop.eup %2827  ;;  %2841 = vpow2.f32 %v1249_v37  ;;  %v1217_v24 = vmul.f32 1.442695, %v4975_v40  ;;  %v1233_v27 = vmul.f32 1.442695, %v1118_v62  ;;  %v4044_v51 = vpack.c.bf16 %v3914_v20, %v3906_v48 }
 0x364   : > { %v1286_v44 = vadd.f32 %v3847_v23, %v1285_v47  ;;  %v1308_v23 = vadd.f32 %v2826_v63, %v1307_v50  ;;  %v2830_v26 = vpop.eup %2829  ;;  %2843 = vpow2.f32 %v1205_v2  ;;  %v4978_v53 = vsub.f32 %v3604_v3, %v3780_v1 }
 0x365   : > { %v4008_v9 = vpop.eup %2831  ;;  %2845 = vpow2.f32 %v1209_v5  ;;  %v1348_v56 = vpack.c.bf16 %v2830_v26, %v2828_v12  ;;  %v1346_v32 = vpack.c.bf16 %v2826_v63, %v3990_v22  ;;  %v1225_v2 = vmul.f32 1.442695, %v1114_v61  ;;  %v4985_v61 = vld [vmem:[#allocation48_spill] sm:$0xff] }
 0x366   : > { %v1287_v17 = vadd.f32 %v3877_v54, %v1286_v44  ;;  %v1309_v25 = vadd.f32 %v2828_v12, %v1308_v23  ;;  %v4974_v54 = vld [vmem:[#allocation53_spill] sm:$0xff]  ;;  %v4013_v0 = vpop.eup %2833  ;;  %2847 = vpow2.f32 %v1237_v18  ;;  %1391 = vmatpush.bf16.msrb.mxu3 %v1349_v4  ;;  %v1221_v10 = vmul.f32 1.442695, %v4978_v53  ;;  %v4980_v18 = vld [vmem:[#allocation32_spill] sm:$0xff] }
 0x367   : > { %v1333_v39 = vpack.c.bf16 %v4974_v54, %v3724_v38  ;;  %v4020_v13 = vpop.eup %2835  ;;  %2849 = vpow2.f32 %v1241_v49  ;;  %v1344_v50 = vpack.c.bf16 %v3982_v46, %v3974_v60  ;;  %v4057_v63 = vpop.permute.xlu1 %636  ;;  %v1342_v12 = vpack.c.bf16 %v3966_v30, %v3957_v55  ;;  %v4981_v60 = vld [vmem:[#allocation34_spill] sm:$0xff]  ;;  %v4983_v49 = vld [vmem:[#allocation33_spill] sm:$0xff] }
 0x368   : > { %v1288_v6 = vadd.f32 %v3851_v7, %v1287_v17  ;;  %v1310_v38 = vadd.f32 %v2830_v26, %v1309_v25  ;;  %v4027_v11 = vpop.eup %2837  ;;  %2851 = vpow2.f32 %v1213_v58  ;;  %4979 = vst [vmem:[#allocation37_spill] sm:$0xff] %v4057_v63  ;;  %v670_v23 = vadd.f32 %v4980_v18, %v4022_v31  ;;  %v4987_v53 = vld [vmem:[#allocation41_spill] sm:$0xff] }
 0x369   : > { %1372 = vmatpush.bf16.msrb.mxu2 %v1333_v39  ;;  %v4035_v45 = vpop.eup %2839  ;;  %v1364_v57 = vpack.c.bf16 %v4027_v11, %v4020_v13  ;;  %2853 = vpow2.f32 %v1217_v24  ;;  %1392 = vmatmul.bf16.vlgmr.msrb.gmra.mxu3 %v4044_v51  ;;  %v672_v46 = vadd.f32 %v4981_v60, %v4057_v63  ;;  %v689_v58 = vadd.f32 %v4982_v41, %v4022_v31  ;;  %v4996_v41 = vld [vmem:[#allocation21_spill] sm:$0xff] }
 0x36a   : > { %v4025_v7 = vadd.f32 %v3856_v52, %v1288_v6  ;;  %v1311_v52 = vadd.f32 %v4008_v9, %v1310_v38  ;;  %v4040_v33 = vpop.eup %2841  ;;  %2855 = vpow2.f32 %v1229_v59  ;;  %v691_v6 = vadd.f32 %v4983_v49, %v4057_v63 }
 0x36b   : > { %v2844_v47 = vpop.eup %2843  ;;  %1422 = vmatpush.bf16.msra.mxu3 %v1364_v57  ;;  %2857 = vpow2.f32 %v1233_v27  ;;  %v1362_v3 = vpack.c.bf16 %v4040_v33, %v4035_v45  ;;  %v1340_v55 = vpack.c.bf16 %v3948_v15, %v3936_v28  ;;  %v741_v30 = vpack.c.bf16 %v672_v46, %v670_v23  ;;  %v4986_v57 = vld [vmem:[#allocation38_spill] sm:$0xff] }
 0x36c   : > { %1373 = vmatmul.bf16.vlgmr.msrb.gmra.mxu2 %v4031_v43  ;;  %v1312_v14 = vadd.f32 %v4013_v0, %v1311_v52  ;;  %v2846_v21 = vpop.eup %2845  ;;  %2859 = vpow2.f32 %v1221_v10  ;;  %v742_v40 = vpack.c.bf16 %v691_v6, %v689_v58  ;;  %v1338_v59 = vpack.c.bf16 %v3924_v42, %v3910_v36  ;;  %v4997_v58 = vld [vmem:[#allocation25_spill] sm:$0xff] }
 0x36d   : > { %1403 = vmatpush.bf16.msra.mxu2 %v1348_v56  ;;  %v2848_v48 = vpop.eup %2847  ;;  %2861 = vpow2.f32 %v1225_v2  ;;  %v1336_v15 = vpack.c.bf16 %v4985_v61, %v4984_v34  ;;  %v1352_v27 = vpack.c.bf16 %v2846_v21, %v2844_v47  ;;  %v1334_v10 = vpack.c.bf16 %v4987_v53, %v4986_v57  ;;  %v5002_v34 = vld [vmem:[#allocation22_spill] sm:$0xff]  ;;  %v1573_v57 = vpop.trf.xlu0 }
 0x36e   : > { %v1313_v20 = vadd.f32 %v2844_v47, %v1312_v14  ;;  %v2850_v1 = vpop.eup %2849  ;;  %v1350_v36 = vpack.c.bf16 %v4013_v0, %v4008_v9  ;;  %v485_v49 = vadd.f32 %v4997_v58, %v4996_v41 }
 0x36f   : > { %v2852_v37 = vpop.eup %2851  ;;  %1423 = vmatpush.bf16.msra.mxu3 %v1362_v3  ;;  %v1360_v16 = vpack.c.bf16 %v2850_v1, %v2848_v48 }
 0x370   : > { %v1314_v44 = vadd.f32 %v2846_v21, %v1313_v20  ;;  %v2854_v22 = vpop.eup %2853  ;;  %v1555_v61 = vpack.c.bf16 %v485_v49, %v5002_v34 }
 0x371   : > { %1404 = vmatpush.bf16.msra.mxu2 %v1346_v32  ;;  %v2856_v19 = vpop.eup %2855  ;;  %v1354_v38 = vpack.c.bf16 %v2854_v22, %v2852_v37 }
 0x372   : > { %v1315_v35 = vadd.f32 %v2852_v37, %v1314_v44  ;;  %v2858_v5 = vpop.eup %2857 }
 0x373   : > { %1424 = vmatpush.bf16.msra.mxu3 %v1360_v16  ;;  %v2860_v17 = vpop.eup %2859  ;;  %v1358_v8 = vpack.c.bf16 %v2858_v5, %v2856_v19  ;;  %v3156_v16 = vmov 3  }
 0x374   : > { %v1316_v29 = vadd.f32 %v2854_v22, %v1315_v35  ;;  %v2862_v62 = vpop.eup %2861  ;;  %2732 = vset.pattern.permute.xlu1 %v3156_v16  ;;  %2733 = vset.pattern.permute.xlu2 %v3156_v16 }
 0x375   : > { %1405 = vmatpush.bf16.msra.mxu2 %v1344_v50  ;;  %v1356_v39 = vpack.c.bf16 %v2862_v62, %v2860_v17  ;;  %2734 = vset.pattern.permute.xlu0 %v3156_v16 }
 0x376   : > { %v1317_v26 = vadd.f32 %v2860_v17, %v1316_v29  ;;  %v3000_v29 = vld [vmem:[%s4820_s6 + $0x18] sm:$0xff] }
 0x377   : > { %1425 = vmatpush.bf16.msra.mxu3 %v1358_v8  ;;  %1534 = vperm.xlu2 %2733, %v3000_v29  }
 0x378   : > { %v1318_v25 = vadd.f32 %v2862_v62, %v1317_v26 }
 0x379   : > { %1406 = vmatpush.bf16.msra.mxu2 %v1342_v12  ;;  %1397 = vmatmul.bf16.gmra.mxu3 %v742_v40 }
 0x37a   : > { %v1319_v54 = vadd.f32 %v2856_v19, %v1318_v25 }
 0x37b   : > { %1426 = vmatpush.bf16.msra.mxu3 %v1356_v39 }
 0x37c   : > { %1378 = vmatmul.bf16.gmra.mxu2 %v741_v30  ;;  %v1320_v24 = vadd.f32 %v2858_v5, %v1319_v54  ;;  %v3001_v54 = vld [vmem:[%s4820_s6 + $0x8] sm:$0xff] }
 0x37d   : > { %1407 = vmatpush.bf16.msra.mxu2 %v1340_v55 }
 0x37e   : > { %v1321_v4 = vadd.f32 %v2848_v48, %v1320_v24  ;;  %v4999_v24 = vld [vmem:[#allocation16_spill] sm:$0xff] }
 0x37f   : > { %1427 = vmatpush.bf16.msra.mxu3 %v1354_v38  ;;  %v5001_v38 = vld [vmem:[#allocation18_spill] sm:$0xff] }
 0x380   : > { %v1322_v56 = vadd.f32 %v2850_v1, %v1321_v4  ;;  %v5000_v4 = vld [vmem:[#allocation20_spill] sm:$0xff] }
 0x381   : > { %1408 = vmatpush.bf16.msra.mxu2 %v1338_v59 }
 0x382   : > { %v1323_v28 = vadd.f32 %v4035_v45, %v1322_v56  ;;  %v4085_v45 = vpop.f32.mrf.mxu2  ;;  %v480_v56 = vadd.f32 %v5001_v38, %v5000_v4  ;;  %v3003_v38 = vld [vmem:[%s3321_s27] sm:$0xff] }
 0x383   : > { %1428 = vmatpush.bf16.msra.mxu3 %v1352_v27  ;;  %4988 = vst [vmem:[#allocation39_spill] sm:$0xff] %v4085_v45 }
 0x384   : > { %v1324_v52 = vadd.f32 %v4040_v33, %v1323_v28  ;;  %v4087_v33 = vpop.f32.mrf.mxu3 }
 0x385   : > { %1409 = vmatpush.bf16.msra.mxu2 %v1336_v15  ;;  %4989 = vst [vmem:[#allocation28_spill] sm:$0xff] %v4087_v33  ;;  %v2660_v15 = vld [vmem:[%s4819_s5] sm:$0xff] }
 0x386   : > { %v1325_v42 = vadd.f32 %v4020_v13, %v1324_v52 }
 0x387   : > { %1429 = vmatpush.bf16.msra.mxu3 %v1350_v36 }
 0x388   : > { %v1326_v14 = vadd.f32 %v4027_v11, %v1325_v42  ;;  %v3002_v42 = vld [vmem:[%s4820_s6 + $0x10] sm:$0xff] }
 0x389   : > { %1410 = vmatpush.bf16.msra.mxu2 %v1334_v10 }
 0x38a   : > { %1430 = vmatmul.bf16.vlgmr.msra.gmra.mxu3 %v4044_v51  ;;  %v4089_v47 = vpop.f32.mrf.mxu2  ;;  %v1327_v26 = vrot.slane %v1326_v14, 4 }
 0x38b   : > { %4990 = vst [vmem:[#allocation43_spill] sm:$0xff] %v4089_v47 }
 0x38c   : > { %1411 = vmatmul.bf16.vlgmr.msra.gmra.mxu2 %v4031_v43  ;;  %v4091_v13 = vpop.f32.mrf.mxu3  ;;  %v1290_v43 = vrot.slane %v4025_v7, 4  ;;  %v1328_v55 = vadd.f32 %v1327_v26, %v1326_v14  ;;  %v5006_v26 = vld [vmem:[#allocation23_spill] sm:$0xff] }
 0x38d   : > { %4991 = vst [vmem:[#allocation30_spill] sm:$0xff] %v4091_v13 }
 0x38e   : > { %v1291_v21 = vadd.f32 %v1290_v43, %v4025_v7  ;;  %v2999_v7 = vld [vmem:[%s4820_s6] sm:$0xff]  ;;  %v1329_v28 = vrot.slane %v1328_v55, 2 }
 0x38f   : > { %1522 = vperm.xlu1 %2732, %v2999_v7   ;;  %v5003_v7 = vld [vmem:[#allocation26_spill] sm:$0xff] }
 0x390   : > { %v1292_v48 = vrot.slane %v1291_v21, 2  ;;  %v1330_v53 = vadd.f32 %v1329_v28, %v1328_v55  ;;  %v504_v29 = vadd.f32 %v5003_v7, %v4996_v41  ;;  %v3004_v28 = vld [vmem:[%s3321_s27 + $0x10] sm:$0xff] }
 0x392   : > { %v4093_v32 = vpop.f32.mrf.mxu2  ;;  %v1293_v3 = vadd.f32 %v1292_v48, %v1291_v21  ;;  %v1331_v36 = vrot.slane %v1330_v53, 1  ;;  %v4126_v21 = vpop.trf.xlu0 }
 0x393   : > { %4992 = vst [vmem:[#allocation44_spill] sm:$0xff] %v4093_v32 }
 0x394   : > { %v4095_v9 = vpop.f32.mrf.mxu3  ;;  %v1294_v37 = vrot.slane %v1293_v3, 1  ;;  %v1332_v43 = vadd.f32 %v1331_v36, %v1330_v53 }
 0x395   : > { %4993 = vst [vmem:[#allocation27_spill] sm:$0xff] %v4095_v9 }
 0x396   : > { %v1295_v50 = vadd.f32 %v1294_v37, %v1293_v3 }
 0x397   : > { %1526 = vperm.xlu1 %2732, %v3001_v54  }
 0x398   : > { %2863 = vrcp.f32 %v1295_v50 }
 0x399   : > { %2865 = vrcp.f32 %v1332_v43 }
 0x39a   : > { %1435 = vmatmul.bf16.gmra.mxu3 %v742_v40  ;;  %v4097_v0 = vpop.f32.mrf.mxu2  ;;  %v4998_v40 = vld [vmem:[#allocation24_spill] sm:$0xff] }
 0x39b   : > { %4994 = vst [vmem:[#allocation29_spill] sm:$0xff] %v4097_v0  ;;  %v478_v59 = vadd.f32 %v4999_v24, %v4998_v40 }
 0x39c   : > { %1416 = vmatmul.bf16.gmra.mxu2 %v741_v30  ;;  %v4099_v11 = vpop.f32.mrf.mxu3 }
 0x39d   : > { %4995 = vst [vmem:[#allocation45_spill] sm:$0xff] %v4099_v11  ;;  %v1553_v27 = vpack.c.bf16 %v480_v56, %v478_v59 }
 0x39e   : > { %v2864_v18 = vpop.eup %2863 }
 0x39f   : > { %1530 = vperm.xlu1 %2732, %v3002_v42   ;;  %v3005_v42 = vld [vmem:[%s3321_s27 + $0x20] sm:$0xff] }
 0x3ec   : > { %v1393_v2 = vpop.f32.mrf.mxu3 }
 0x3ef   : > { %v1374_v51 = vpop.f32.mrf.mxu2 }
 0x3f0   : > { %v1394_v23 = vadd.f32 %v1393_v2, %v1374_v51  ;;  %v2661_v2 = vld [vmem:[%s4819_s5 + $0x8] sm:$0xff] }
 0x3f2   : > { %v1443_v25 = vmul.f32 %v2864_v18, %v1394_v23 }
 0x3f4   : > { %v1395_v1 = vpop.f32.mrf.mxu3 }
 0x3f7   : > { %v1376_v20 = vpop.f32.mrf.mxu2 }
 0x3f8   : > { %v1396_v12 = vadd.f32 %v1395_v1, %v1376_v20 }
 0x3fa   : > { %v1445_v8 = vmul.f32 %v2864_v18, %v1396_v12 }
 0x3fc   : > { %v1398_v22 = vpop.f32.mrf.mxu3  ;;  %v1455_v39 = vpack.c.bf16 %v1445_v8, %v1443_v25  ;;  %v1556_v8 = vpack.c.bf16 %v504_v29, %v5006_v26 }
 0x3ff   : > { %v1379_v44 = vpop.f32.mrf.mxu2 }
 0x400   : > { %v1399_v35 = vadd.f32 %v1398_v22, %v1379_v44  ;;  %v2866_v44 = vpop.eup %2865 }
 0x401   : > { %v4161_v24 = vpop.permute.xlu1 %1522 }
 0x402   : > { %v1447_v60 = vmul.f32 %v2864_v18, %v1399_v35  ;;  %v1575_v35 = vpop.trf.xlu0  ;;  %5007 = vst [vmem:[#allocation46_spill] sm:$0xff] %v4161_v24 }
 0x404   : > { %v1400_v5 = vpop.f32.mrf.mxu3 }
 0x407   : > { %v1381_v19 = vpop.f32.mrf.mxu2 }
 0x408   : > { %v1401_v17 = vadd.f32 %v1400_v5, %v1381_v19 }
 0x40a   : > { %v1449_v46 = vmul.f32 %v2864_v18, %v1401_v17  ;;  %v5004_v18 = vld [vmem:[#allocation17_spill] sm:$0xff] }
 0x40b   : > { %v497_v23 = vadd.f32 %v5004_v18, %v4998_v40 }
 0x40c   : > { %v1457_v62 = vpack.c.bf16 %v1449_v46, %v1447_v60  ;;  %v5005_v60 = vld [vmem:[#allocation19_spill] sm:$0xff] }
 0x40d   : > { %v1431_v30 = vpop.f32.mrf.mxu3  ;;  %v499_v46 = vadd.f32 %v5005_v60, %v5000_v4 }
 0x40e   : > { %1481 = vmatpush.bf16.msrb.mxu2 %v1457_v62  ;;  %v4139_v62 = vpop.trf.xlu0 }
 0x40f   : > { %v1412_v6 = vpop.f32.mrf.mxu2  ;;  %v1554_v58 = vpack.c.bf16 %v499_v46, %v497_v23  ;;  %v3010_v46 = vld [vmem:[%s3321_s27 + $0x38] sm:$0xff] }
 0x410   : > { %v1432_v50 = vadd.f32 %v1431_v30, %v1412_v6 }
 0x412   : > { %1482 = vmatpush.bf16.msrb.mxu2 %v1455_v39  ;;  %v1444_v12 = vmul.f32 %v2866_v44, %v1432_v50 }
 0x415   : > { %2588 = vmatmul.msk.bf16.vlgmr.msrb.gmra.mxu2 %vm536_vm1, %v2660_v15  ;;  %v1433_v10 = vpop.f32.mrf.mxu3 }
 0x416   : > { %1643 = vmatpush.bf16.msra.mxu2 %v1555_v61  ;;  %v1577_v41 = vpop.trf.xlu0  ;;  %v4174_v61 = vpop.permute.xlu1 %1526 }
 0x417   : > { %v1414_v52 = vpop.f32.mrf.mxu2  ;;  %5008 = vst [vmem:[#allocation47_spill] sm:$0xff] %v4174_v61 }
 0x418   : > { %v1434_v1 = vadd.f32 %v1433_v10, %v1414_v52 }
 0x41a   : > { %1644 = vmatpush.bf16.msra.mxu2 %v1553_v27  ;;  %v1446_v16 = vmul.f32 %v2866_v44, %v1434_v1 }
 0x41c   : > { %v1456_v17 = vpack.c.bf16 %v1446_v16, %v1444_v12  ;;  %v3009_v12 = vld [vmem:[%s3321_s27 + $0x28] sm:$0xff] }
 0x41d   : > { %v1436_v51 = vpop.f32.mrf.mxu3 }
 0x41e   : > { %v4145_v49 = vpop.trf.xlu0  ;;  %v4181_v10 = vpop.permute.xlu1 %1530 }
 0x41f   : > { %v1417_v14 = vpop.f32.mrf.mxu2  ;;  %5009 = vst [vmem:[#allocation49_spill] sm:$0xff] %v4181_v10 }
 0x420   : > { %v1437_v20 = vadd.f32 %v1436_v51, %v1417_v14  ;;  %v4186_v51 = vpop.permute.xlu2 %1534 }
 0x421   : > { %5010 = vst [vmem:[#allocation51_spill] sm:$0xff] %v4186_v51 }
 0x422   : > { %v1448_v22 = vmul.f32 %v2866_v44, %v1437_v20 }
 0x425   : > { %2589 = vmatmul.msk.bf16.gmra.mxu2 %vm536_vm1, %v2661_v2  ;;  %v1438_v3 = vpop.f32.mrf.mxu3 }
 0x426   : > { %v1579_v6 = vpop.trf.xlu0 }
 0x427   : > { %v1419_v48 = vpop.f32.mrf.mxu2 }
 0x428   : > { %v1439_v37 = vadd.f32 %v1438_v3, %v1419_v48 }
 0x42a   : > { %v1450_v19 = vmul.f32 %v2866_v44, %v1439_v37  ;;  %v3007_v37 = vld [vmem:[%s3321_s27 + $0x8] sm:$0xff] }
 0x42c   : > { %v1458_v5 = vpack.c.bf16 %v1450_v19, %v1448_v22 }
 0x42e   : > { %1500 = vmatpush.bf16.msrb.mxu3 %v1458_v5  ;;  %v4149_v25 = vpop.trf.xlu0 }
 0x432   : > { %1501 = vmatpush.bf16.msrb.mxu3 %v1456_v17 }
 0x435   : > { %2590 = vmatmul.msk.bf16.vlgmr.msrb.gmra.mxu3 %vm536_vm1, %v2660_v15  ;;  %2592 = vmatmul.msk.bf16.vlgmr.msra.gmra.mxu2 %vm536_vm1, %v1573_v57 }
 0x436   : > { %1732 = vmatpush.bf16.msra.mxu3 %v1556_v8  ;;  %v1581_v55 = vpop.trf.xlu0 }
 0x43a   : > { %1733 = vmatpush.bf16.msra.mxu3 %v1554_v58 }
 0x43e   : > { %v4153_v30 = vpop.trf.xlu0 }
 0x445   : > { %2591 = vmatmul.msk.bf16.gmra.mxu3 %vm536_vm1, %v2661_v2  ;;  %2593 = vmatmul.msk.bf16.gmra.mxu2 %vm536_vm1, %v1575_v35  ;;  %v3006_v2 = vld [vmem:[%s3321_s27 + $0x30] sm:$0xff] }
 0x446   : > { %v1583_v54 = vpop.trf.xlu0 }
 0x44e   : > { %v4157_v39 = vpop.trf.xlu0 }
 0x455   : > { %2594 = vmatmul.msk.bf16.gmra.mxu2 %vm536_vm1, %v1577_v41  ;;  %2608 = vmatmul.msk.bf16.vlgmr.msra.gmra.mxu3 %vm536_vm1, %v1573_v57 }
 0x456   : > { %v1585_v40 = vpop.trf.xlu0 }
 0x45e   : > { %v4165_v4 = vpop.trf.xlu0 }
 0x465   : > { %2595 = vmatmul.msk.bf16.gmra.mxu2 %vm536_vm1, %v1579_v6  ;;  %2609 = vmatmul.msk.bf16.gmra.mxu3 %vm536_vm1, %v1575_v35  ;;  %v3008_v35 = vld [vmem:[%s3321_s27 + $0x18] sm:$0xff] }
 0x466   : > { %v1587_v52 = vpop.trf.xlu0 }
 0x475   : > { %2596 = vmatmul.msk.bf16.gmra.mxu2 %vm536_vm1, %v1581_v55  ;;  %2610 = vmatmul.msk.bf16.gmra.mxu3 %vm536_vm1, %v1577_v41 }
 0x485   : > { %2597 = vmatmul.msk.bf16.gmra.mxu2 %vm536_vm1, %v1583_v54  ;;  %2611 = vmatmul.msk.bf16.gmra.mxu3 %vm536_vm1, %v1579_v6 }
 0x495   : > { %2598 = vmatmul.msk.bf16.gmra.mxu2 %vm536_vm1, %v1585_v40  ;;  %2612 = vmatmul.msk.bf16.gmra.mxu3 %vm536_vm1, %v1581_v55 }
 0x498   : > { %v1484_v59 = vpop.f32.mrf.mxu2 }
 0x499   : > { %v1513_v56 = vadd.f32 %v3003_v38, %v1484_v59 }
 0x49b   : > { %v1537_v34 = vadd.f32 %v4161_v24, %v1513_v56 }
 0x49d   : > { %1545 = vst [vmem:[%s4171_s30] sm:$0xff] %v1537_v34 }
 0x4a0   : > { %v1486_v15 = vpop.f32.mrf.mxu2 }
 0x4a1   : > { %v1515_v27 = vadd.f32 %v3004_v28, %v1486_v15 }
 0x4a3   : > { %v1539_v57 = vadd.f32 %v4174_v61, %v1515_v27 }
 0x4a5   : > { %1547 = vst [vmem:[%s4171_s30 + $0x10] sm:$0xff] %v1539_v57  ;;  %2599 = vmatmul.msk.bf16.gmra.mxu2 %vm536_vm1, %v1587_v52  ;;  %2613 = vmatmul.msk.bf16.gmra.mxu3 %vm536_vm1, %v1583_v54 }
 0x4a8   : > { %v1489_v53 = vpop.f32.mrf.mxu2 }
 0x4a9   : > { %v1517_v36 = vadd.f32 %v3005_v42, %v1489_v53  ;;  %v1588_v42 = vpop.trf.xlu0 }
 0x4ab   : > { %v1541_v14 = vadd.f32 %v4181_v10, %v1517_v36 }
 0x4ad   : > { %1549 = vst [vmem:[%s4171_s30 + $0x20] sm:$0xff] %v1541_v14 }
 0x4b0   : > { %v1491_v43 = vpop.f32.mrf.mxu2 }
 0x4b1   : > { %v1519_v48 = vadd.f32 %v3006_v2, %v1491_v43 }
 0x4b3   : > { %v1543_v20 = vadd.f32 %v4186_v51, %v1519_v48 }
 0x4b5   : > { %1551 = vst [vmem:[%s4171_s30 + $0x30] sm:$0xff] %v1543_v20  ;;  %2600 = vmatmul.msk.bf16.gmra.mxu2 %vm536_vm1, %v4126_v21  ;;  %2614 = vmatmul.msk.bf16.gmra.mxu3 %vm536_vm1, %v1585_v40 }
 0x4b8   : > { %v1503_v3 = vpop.f32.mrf.mxu3  ;;  %v4194_v1 = vpop.f32.mrf.mxu2 }
 0x4b9   : > { %v1514_v44 = vadd.f32 %v3007_v37, %v1503_v3 }
 0x4bb   : > { %v1538_v50 = vadd.f32 %v4161_v24, %v1514_v44 }
 0x4bd   : > { %1546 = vst [vmem:[%s4171_s30 + $0x8] sm:$0xff] %v1538_v50 }
 0x4c0   : > { %v1505_v22 = vpop.f32.mrf.mxu3  ;;  %v4199_v19 = vpop.f32.mrf.mxu2 }
 0x4c1   : > { %v1516_v16 = vadd.f32 %v3008_v35, %v1505_v22 }
 0x4c3   : > { %v1540_v5 = vadd.f32 %v4174_v61, %v1516_v16 }
 0x4c5   : > { %1548 = vst [vmem:[%s4171_s30 + $0x18] sm:$0xff] %v1540_v5  ;;  %2601 = vmatmul.msk.bf16.gmra.mxu2 %vm536_vm1, %v4139_v62  ;;  %2615 = vmatmul.msk.bf16.gmra.mxu3 %vm536_vm1, %v1587_v52 }
 0x4c8   : > { %v1508_v7 = vpop.f32.mrf.mxu3  ;;  %v4207_v29 = vpop.f32.mrf.mxu2 }
 0x4c9   : > { %v1518_v17 = vadd.f32 %v3009_v12, %v1508_v7  ;;  %v1815_v61 = vmax.f32 %v4194_v1, %v4207_v29 }
 0x4cb   : > { %v1542_v18 = vadd.f32 %v4181_v10, %v1518_v17 }
 0x4cd   : > { %1550 = vst [vmem:[%s4171_s30 + $0x28] sm:$0xff] %v1542_v18 }
 0x4d0   : > { %v1510_v23 = vpop.f32.mrf.mxu3  ;;  %v4212_v60 = vpop.f32.mrf.mxu2 }
 0x4d1   : > { %v1520_v26 = vadd.f32 %v3010_v46, %v1510_v23  ;;  %v1816_v24 = vmax.f32 %v4199_v19, %v4212_v60 }
 0x4d3   : > { %v1544_v8 = vadd.f32 %v4186_v51, %v1520_v26 }
 0x4d5   : > { %1552 = vst [vmem:[%s4171_s30 + $0x38] sm:$0xff] %v1544_v8  ;;  %2602 = vmatmul.msk.bf16.gmra.mxu2 %vm536_vm1, %v4145_v49  ;;  %2616 = vmatmul.msk.bf16.gmra.mxu3 %vm536_vm1, %v4126_v21 }
 0x4d8   : > { %v4221_v58 = vpop.f32.mrf.mxu2  ;;  %v4223_v41 = vpop.f32.mrf.mxu3 }
 0x4d9   : > { %5011 = vst [vmem:[#allocation52_spill] sm:$0xff] %v4223_v41  ;;  %v1817_v11 = vmax.f32 %v1815_v61, %v4221_v58 }
 0x4e0   : > { %v4225_v6 = vpop.f32.mrf.mxu2  ;;  %v4227_v55 = vpop.f32.mrf.mxu3 }
 0x4e1   : > { %v1818_v9 = vmax.f32 %v1816_v24, %v4225_v6 }
 0x4e5   : > { %2603 = vmatmul.msk.bf16.gmra.mxu2 %vm536_vm1, %v4149_v25  ;;  %2617 = vmatmul.msk.bf16.gmra.mxu3 %vm536_vm1, %v4139_v62 }
 0x4e8   : > { %v4233_v54 = vpop.f32.mrf.mxu2  ;;  %v4235_v40 = vpop.f32.mrf.mxu3 }
 0x4e9   : > { %5012 = vst [vmem:[#allocation53_spill] sm:$0xff] %v4233_v54  ;;  %v1819_v63 = vmax.f32 %v1817_v11, %v4233_v54 }
 0x4ea   : > { %5013 = vst [vmem:[#allocation50_spill] sm:$0xff] %v4235_v40 }
 0x4f0   : > { %v4237_v59 = vpop.f32.mrf.mxu2  ;;  %v4239_v21 = vpop.f32.mrf.mxu3 }
 0x4f1   : > { %v1820_v32 = vmax.f32 %v1818_v9, %v4237_v59 }
 0x4f5   : > { %2604 = vmatmul.msk.bf16.gmra.mxu2 %vm536_vm1, %v4153_v30  ;;  %2618 = vmatmul.msk.bf16.gmra.mxu3 %vm536_vm1, %v4145_v49 }
 0x4f8   : > { %v4245_v38 = vpop.f32.mrf.mxu2  ;;  %v4247_v56 = vpop.f32.mrf.mxu3 }
 0x4f9   : > { %v1821_v31 = vmax.f32 %v1819_v63, %v4245_v38 }
 0x500   : > { %v4249_v34 = vpop.f32.mrf.mxu2  ;;  %v4251_v62 = vpop.f32.mrf.mxu3 }
 0x501   : > { %v1822_v33 = vmax.f32 %v1820_v32, %v4249_v34 }
 0x505   : > { %2605 = vmatmul.msk.bf16.gmra.mxu2 %vm536_vm1, %v4157_v39  ;;  %2619 = vmatmul.msk.bf16.gmra.mxu3 %vm536_vm1, %v4149_v25 }
 0x508   : > { %v4257_v15 = vpop.f32.mrf.mxu2  ;;  %v4259_v28 = vpop.f32.mrf.mxu3 }
 0x509   : > { %v1823_v47 = vmax.f32 %v1821_v31, %v4257_v15 }
 0x510   : > { %v4261_v27 = vpop.f32.mrf.mxu2  ;;  %v4263_v49 = vpop.f32.mrf.mxu3 }
 0x511   : > { %5014 = vst [vmem:[#allocation32_spill] sm:$0xff] %v4261_v27  ;;  %v1824_v45 = vmax.f32 %v1822_v33, %v4261_v27 }
 0x515   : > { %2606 = vmatmul.msk.bf16.gmra.mxu2 %vm536_vm1, %v4165_v4  ;;  %2620 = vmatmul.msk.bf16.gmra.mxu3 %vm536_vm1, %v4153_v30 }
 0x518   : > { %v4269_v52 = vpop.f32.mrf.mxu2  ;;  %v4271_v57 = vpop.f32.mrf.mxu3 }
 0x519   : > { %v1825_v61 = vmax.f32 %v1823_v47, %v4269_v52 }
 0x520   : > { %v4273_v53 = vpop.f32.mrf.mxu2  ;;  %v4275_v25 = vpop.f32.mrf.mxu3 }
 0x521   : > { %v1826_v24 = vmax.f32 %v1824_v45, %v4273_v53 }
 0x525   : > { %2607 = vmatmul.msk.bf16.gmra.mxu2 %vm536_vm1, %v1588_v42  ;;  %2621 = vmatmul.msk.bf16.gmra.mxu3 %vm536_vm1, %v4157_v39 }
 0x528   : > { %v4280_v36 = vpop.f32.mrf.mxu2  ;;  %v4282_v14 = vpop.f32.mrf.mxu3 }
 0x530   : > { %v4284_v43 = vpop.f32.mrf.mxu2  ;;  %v4286_v30 = vpop.f32.mrf.mxu3 }
 0x531   : > { %5015 = vst [vmem:[#allocation34_spill] sm:$0xff] %v4286_v30  ;;  %v1828_v11 = vmax.f32 %v1826_v24, %v4284_v43 }
 0x535   : > { %2622 = vmatmul.msk.bf16.gmra.mxu3 %vm536_vm1, %v4165_v4 }
 0x538   : > { %v4290_v2 = vpop.f32.mrf.mxu2  ;;  %v4292_v48 = vpop.f32.mrf.mxu3 }
 0x539   : > { %5016 = vst [vmem:[#allocation31_spill] sm:$0xff] %v4290_v2 }
 0x540   : > { %v4294_v20 = vpop.f32.mrf.mxu2  ;;  %v4296_v3 = vpop.f32.mrf.mxu3 }
 0x541   : > { %v1830_v32 = vmax.f32 %v1828_v11, %v4294_v20 }
 0x545   : > { %2623 = vmatmul.msk.bf16.gmra.mxu3 %vm536_vm1, %v1588_v42 }
 0x548   : > { %v4299_v39 = vpop.f32.mrf.mxu2  ;;  %v4301_v37 = vpop.f32.mrf.mxu3 }
 0x550   : > { %v4303_v44 = vpop.f32.mrf.mxu2  ;;  %v4305_v50 = vpop.f32.mrf.mxu3 }
 0x551   : > { %v1832_v33 = vmax.f32 %v1830_v32, %v4303_v44 }
 0x558   : > { %v4307_v22 = vpop.f32.mrf.mxu2  ;;  %v4309_v4 = vpop.f32.mrf.mxu3 }
 0x560   : > { %v4311_v35 = vpop.f32.mrf.mxu2  ;;  %v4313_v16 = vpop.f32.mrf.mxu3 }
 0x561   : > { %v1834_v45 = vmax.f32 %v1832_v33, %v4311_v35 }
 0x568   : > { %v4315_v5 = vpop.f32.mrf.mxu2  ;;  %v4317_v7 = vpop.f32.mrf.mxu3 }
 0x570   : > { %v4319_v12 = vpop.f32.mrf.mxu2  ;;  %v4321_v17 = vpop.f32.mrf.mxu3 }
 0x571   : > { %5017 = vst [vmem:[#allocation33_spill] sm:$0xff] %v4319_v12  ;;  %v1836_v24 = vmax.f32 %v1834_v45, %v4319_v12 }
 0x572   : > { %5018 = vst [vmem:[#allocation42_spill] sm:$0xff] %v4321_v17 }
 0x578   : > { %v4323_v18 = vpop.f32.mrf.mxu2  ;;  %v4325_v23 = vpop.f32.mrf.mxu3 }
 0x579   : > { %5019 = vst [vmem:[#allocation48_spill] sm:$0xff] %v4323_v18 }
 0x57a   : > { %5020 = vst [vmem:[#allocation38_spill] sm:$0xff] %v4325_v23 }
 0x580   : > { %v4327_v46 = vpop.f32.mrf.mxu2  ;;  %v4329_v26 = vpop.f32.mrf.mxu3 }
 0x581   : > { %5021 = vst [vmem:[#allocation41_spill] sm:$0xff] %v4327_v46 }
 0x582   : > { %5022 = vst [vmem:[#allocation21_spill] sm:$0xff] %v4329_v26 }
 0x588   : > { %v4331_v8 = vpop.f32.mrf.mxu2  ;;  %v4333_v42 = vpop.f32.mrf.mxu3 }
 0x589   : > { %5023 = vst [vmem:[#allocation25_spill] sm:$0xff] %v4333_v42 }
 0x590   : > { %v4335_v51 = vpop.f32.mrf.mxu2  ;;  %v4337_v10 = vpop.f32.mrf.mxu3 }
 0x591   : > { %5024 = vst [vmem:[#allocation24_spill] sm:$0xff] %v4335_v51 }
 0x592   : > { %5025 = vst [vmem:[#allocation16_spill] sm:$0xff] %v4337_v10 }
 0x598   : > { %v4345_v13 = vpop.f32.mrf.mxu2  ;;  %v4347_v0 = vpop.f32.mrf.mxu3 }
 0x599   : > { %5026 = vst [vmem:[#allocation20_spill] sm:$0xff] %v4347_v0  ;;  %v1827_v0 = vmax.f32 %v1825_v61, %v4280_v36 }
 0x59b   : > { %v1829_v63 = vmax.f32 %v1827_v0, %v4290_v2  ;;  %v1838_v0 = vmax.f32 %v1836_v24, %v4327_v46 }
 0x59d   : > { %v1831_v31 = vmax.f32 %v1829_v63, %v4299_v39  ;;  %v1840_v63 = vmax.f32 %v1838_v0, %v4335_v51  ;;  %v1853_v0 = vmax.f32 %v4227_v55, %v4239_v21 }
 0x59f   : > { %v1833_v47 = vmax.f32 %v1831_v31, %v4307_v22  ;;  %v1855_v51 = vmax.f32 %v1853_v0, %v4251_v62 }
 0x5a0   : > { %v4357_v10 = vpop.f32.mrf.mxu2  ;;  %v4361_v54 = vpop.f32.mrf.mxu3 }
 0x5a1   : > { %5027 = vst [vmem:[#allocation18_spill] sm:$0xff] %v4361_v54  ;;  %v1835_v61 = vmax.f32 %v1833_v47, %v4315_v5  ;;  %v1842_v31 = vmax.f32 %v1840_v63, %v4357_v10 }
 0x5a3   : > { %v1837_v27 = vmax.f32 %v1835_v61, %v4323_v18 }
 0x5a5   : > { %v1839_v11 = vmax.f32 %v1837_v27, %v4331_v8  ;;  %v1852_v27 = vmax.f32 %v4223_v41, %v4235_v40 }
 0x5a7   : > { %v1841_v32 = vmax.f32 %v1839_v11, %v4345_v13  ;;  %v1854_v11 = vmax.f32 %v1852_v27, %v4247_v56 }
 0x5a8   : > { %v4369_v9 = vpop.f32.mrf.mxu2  ;;  %v4375_v2 = vpop.f32.mrf.mxu3 }
 0x5a9   : > { %5028 = vst [vmem:[#allocation22_spill] sm:$0xff] %v4375_v2  ;;  %v1843_v47 = vmax.f32 %v1841_v32, %v4369_v9  ;;  %v1856_v32 = vmax.f32 %v1854_v11, %v4259_v28 }
 0x5b0   : > { %v4381_v33 = vpop.f32.mrf.mxu2  ;;  %v4385_v18 = vpop.f32.mrf.mxu3 }
 0x5b1   : > { %v1844_v45 = vmax.f32 %v1842_v31, %v4381_v33  ;;  %5029 = vst [vmem:[#allocation26_spill] sm:$0xff] %v4385_v18 }
 0x5b3   : > { %v1845_v12 = vmax.f32 %v1843_v47, %v1844_v45  ;;  %v1857_v45 = vmax.f32 %v1855_v51, %v4263_v49 }
 0x5b5   : > { %v1846_v61 = vrot.slane %v1845_v12, 4 }
 0x5b7   : > { %v1847_v24 = vmax.f32 %v1845_v12, %v1846_v61  ;;  %v1858_v12 = vmax.f32 %v1856_v32, %v4271_v57  ;;  %v1859_v61 = vmax.f32 %v1857_v45, %v4275_v25 }
 0x5b8   : > { %v4394_v47 = vpop.f32.mrf.mxu3 }
 0x5b9   : > { %v1848_v46 = vrot.slane %v1847_v24, 2  ;;  %v1860_v40 = vmax.f32 %v1858_v12, %v4282_v14  ;;  %v1861_v27 = vmax.f32 %v1859_v61, %v4286_v30 }
 0x5bb   : > { %v1849_v63 = vmax.f32 %v1847_v24, %v1848_v46  ;;  %v1862_v46 = vmax.f32 %v1860_v40, %v4292_v48  ;;  %v1863_v24 = vmax.f32 %v1861_v27, %v4296_v3 }
 0x5bd   : > { %v1850_v31 = vrot.slane %v1849_v63, 1  ;;  %v1864_v0 = vmax.f32 %v1862_v46, %v4301_v37  ;;  %v1865_v45 = vmax.f32 %v1863_v24, %v4305_v50 }
 0x5bf   : > { %v4400_v41 = vmax.f32 %v1849_v63, %v1850_v31  ;;  %v1866_v31 = vmax.f32 %v1864_v0, %v4309_v4  ;;  %v1867_v40 = vmax.f32 %v1865_v45, %v4313_v16 }
 0x5c0   : > { %v4410_v32 = vpop.f32.mrf.mxu3 }
 0x5c1   : > { %v1889_v11 = vsub.f32 %v4194_v1, %v4400_v41  ;;  %v1891_v51 = vsub.f32 %v4199_v19, %v4400_v41  ;;  %v1893_v63 = vsub.f32 %v4207_v29, %v4400_v41  ;;  %v1895_v12 = vsub.f32 %v4212_v60, %v4400_v41 }
 0x5c2   : > { %v1868_v61 = vmax.f32 %v1866_v31, %v4317_v7  ;;  %v1869_v19 = vmax.f32 %v1867_v40, %v4321_v17  ;;  %v1897_v46 = vsub.f32 %v4221_v58, %v4400_v41  ;;  %v1899_v0 = vsub.f32 %v4225_v6, %v4400_v41  ;;  %v5031_v40 = vld [vmem:[#allocation16_spill] sm:$0xff] }
 0x5c3   : > { %v1953_v1 = vmul.f32 1.442695, %v1889_v11  ;;  %v1957_v27 = vmul.f32 1.442695, %v1891_v51  ;;  %v1961_v24 = vmul.f32 1.442695, %v1893_v63  ;;  %v1903_v63 = vsub.f32 %v4237_v59, %v4400_v41 }
 0x5c4   : > { %v1870_v30 = vmax.f32 %v1868_v61, %v4325_v23  ;;  %v1871_v29 = vmax.f32 %v1869_v19, %v4329_v26  ;;  %v1965_v60 = vmul.f32 1.442695, %v1895_v12  ;;  %v5030_v11 = vld [vmem:[#allocation53_spill] sm:$0xff]  ;;  %v1969_v61 = vmul.f32 1.442695, %v1897_v46 }
 0x5c5   : > { %2867 = vpow2.f32 %v1953_v1  ;;  %v1901_v51 = vsub.f32 %v5030_v11, %v4400_v41  ;;  %v5032_v1 = vld [vmem:[#allocation20_spill] sm:$0xff]  ;;  %v1905_v6 = vsub.f32 %v4245_v38, %v4400_v41  ;;  %v1917_v59 = vsub.f32 %v4280_v36, %v4400_v41 }
 0x5c6   : > { %2869 = vpow2.f32 %v1957_v27  ;;  %v1872_v45 = vmax.f32 %v1870_v30, %v4333_v42  ;;  %v1873_v58 = vmax.f32 %v1871_v29, %v5031_v40  ;;  %v1907_v30 = vsub.f32 %v4249_v34, %v4400_v41 }
 0x5c7   : > { %2871 = vpow2.f32 %v1961_v24  ;;  %v1973_v27 = vmul.f32 1.442695, %v1899_v0  ;;  %v1977_v46 = vmul.f32 1.442695, %v1901_v51  ;;  %v1919_v38 = vsub.f32 %v4284_v43, %v4400_v41 }
 0x5c8   : > { %v4430_v31 = vpop.f32.mrf.mxu3  ;;  %v1874_v19 = vmax.f32 %v1872_v45, %v5032_v1  ;;  %v1875_v12 = vmax.f32 %v1873_v58, %v4361_v54  ;;  %2873 = vpow2.f32 %v1965_v60  ;;  %v1981_v45 = vmul.f32 1.442695, %v1903_v63 }
 0x5c9   : > { %2875 = vpow2.f32 %v1969_v61  ;;  %v1913_v34 = vsub.f32 %v4269_v52, %v4400_v41  ;;  %v1985_v0 = vmul.f32 1.442695, %v1905_v6  ;;  %v1915_v51 = vsub.f32 %v4273_v53, %v4400_v41 }
 0x5ca   : > { %v1876_v29 = vmax.f32 %v1874_v19, %v4375_v2  ;;  %v1877_v58 = vmax.f32 %v1875_v12, %v4385_v18  ;;  %2877 = vpow2.f32 %v1973_v27  ;;  %v1989_v43 = vmul.f32 1.442695, %v1907_v30 }
 0x5cb   : > { %v4441_v11 = vpop.eup %2867  ;;  %v1909_v61 = vsub.f32 %v4257_v15, %v4400_v41  ;;  %2879 = vpow2.f32 %v1977_v46  ;;  %v2009_v52 = vmul.f32 1.442695, %v1917_v59  ;;  %v2001_v30 = vmul.f32 1.442695, %v1913_v34  ;;  %v5033_v15 = vld [vmem:[#allocation32_spill] sm:$0xff] }
 0x5cc   : > { %v4446_v24 = vpop.eup %2869  ;;  %v1878_v19 = vmax.f32 %v1876_v29, %v4394_v47  ;;  %v1879_v63 = vmax.f32 %v1877_v58, %v4410_v32  ;;  %2881 = vpow2.f32 %v1981_v45  ;;  %v2013_v29 = vmul.f32 1.442695, %v1919_v38 }
 0x5cd   : > { %v2081_v60 = vadd.f32 %v4446_v24, %v4441_v11  ;;  %v4456_v36 = vpop.eup %2871  ;;  %2883 = vpow2.f32 %v1985_v0  ;;  %v1911_v59 = vsub.f32 %v5033_v15, %v4400_v41  ;;  %v2005_v46 = vmul.f32 1.442695, %v1915_v51 }
 0x5ce   : > { %v4466_v40 = vpop.eup %2873  ;;  %v1880_v42 = vmax.f32 %v1878_v19, %v4430_v31  ;;  %2885 = vpow2.f32 %v1989_v43  ;;  %v1993_v19 = vmul.f32 1.442695, %v1909_v61 }
 0x5cf   : > { %v2082_v6 = vadd.f32 %v4456_v36, %v2081_v60  ;;  %v4471_v58 = vpop.eup %2875  ;;  %2887 = vpow2.f32 %v2009_v52  ;;  %v1997_v26 = vmul.f32 1.442695, %v1911_v59  ;;  %v1923_v59 = vsub.f32 %v4294_v20, %v4400_v41 }
 0x5d0   : > { %v4464_v12 = vpop.f32.mrf.mxu3  ;;  %v4476_v38 = vpop.eup %2877  ;;  %2889 = vpow2.f32 %v2013_v29 }
 0x5d1   : > { %v1881_v53 = vmax.f32 %v1879_v63, %v4464_v12  ;;  %v2083_v27 = vadd.f32 %v4466_v40, %v2082_v6  ;;  %v4478_v0 = vpop.eup %2879  ;;  %2891 = vpow2.f32 %v2001_v30 }
 0x5d2   : > { %v4481_v6 = vpop.eup %2881  ;;  %2893 = vpow2.f32 %v2005_v46 }
 0x5d3   : > { %v1882_v60 = vmax.f32 %v1880_v42, %v1881_v53  ;;  %v2084_v45 = vadd.f32 %v4471_v58, %v2083_v27  ;;  %v4483_v51 = vpop.eup %2883  ;;  %2895 = vpow2.f32 %v1993_v19  ;;  %v5034_v53 = vld [vmem:[#allocation31_spill] sm:$0xff] }
 0x5d4   : > { %v4486_v52 = vpop.eup %2885  ;;  %v1921_v27 = vsub.f32 %v5034_v53, %v4400_v41  ;;  %2897 = vpow2.f32 %v1997_v26  ;;  %v1951_v53 = vsub.f32 %v4381_v33, %v4400_v41 }
 0x5d5   : > { %v1883_v63 = vrot.slane %v1882_v60, 4  ;;  %v2085_v34 = vadd.f32 %v4476_v38, %v2084_v45  ;;  %v2888_v29 = vpop.eup %2887  ;;  %v1949_v45 = vsub.f32 %v4369_v9, %v4400_v41  ;;  %v2021_v9 = vmul.f32 1.442695, %v1923_v59 }
 0x5d6   : > { %v4491_v15 = vpop.eup %2889  ;;  %v2017_v54 = vmul.f32 1.442695, %v1921_v27  ;;  %v1933_v27 = vsub.f32 %v4315_v5, %v4400_v41  ;;  %v1947_v5 = vsub.f32 %v4357_v10, %v4400_v41 }
 0x5d7   : > { %v1884_v43 = vmax.f32 %v1882_v60, %v1883_v63  ;;  %v2086_v42 = vadd.f32 %v4478_v0, %v2085_v34  ;;  %v2892_v60 = vpop.eup %2891  ;;  %v2169_v63 = vpack.c.bf16 %v4491_v15, %v2888_v29  ;;  %v2073_v1 = vmul.f32 1.442695, %v1949_v45 }
 0x5d8   : > { %v2894_v34 = vpop.eup %2893  ;;  %2899 = vpow2.f32 %v2017_v54  ;;  %v5035_v54 = vld [vmem:[#allocation24_spill] sm:$0xff] }
 0x5d9   : > { %v1885_v61 = vrot.slane %v1884_v43, 2  ;;  %v2087_v30 = vadd.f32 %v4481_v6, %v2086_v42  ;;  %v1925_v42 = vsub.f32 %v4299_v39, %v4400_v41  ;;  %2187 = vmatpush.bf16.msra.mxu0 %v2169_v63  ;;  %v2896_v26 = vpop.eup %2895  ;;  %v2167_v17 = vpack.c.bf16 %v2894_v34, %v2892_v60 }
 0x5da   : > { %v2898_v33 = vpop.eup %2897  ;;  %v1931_v39 = vsub.f32 %v4311_v35, %v4400_v41  ;;  %v1941_v63 = vsub.f32 %v4331_v8, %v4400_v41  ;;  %2901 = vpow2.f32 %v2021_v9 }
 0x5db   : > { %v1886_v46 = vmax.f32 %v1884_v43, %v1885_v61  ;;  %v2088_v19 = vadd.f32 %v4483_v51, %v2087_v30  ;;  %v1927_v43 = vsub.f32 %v4303_v44, %v4400_v41  ;;  %v1929_v30 = vsub.f32 %v4307_v22, %v4400_v41 }
 0x5dc   : > { %v2025_v44 = vmul.f32 1.442695, %v1925_v42  ;;  %v1945_v22 = vsub.f32 %v4345_v13, %v4400_v41  ;;  %2903 = vpow2.f32 %v2073_v1  ;;  %v2165_v2 = vpack.c.bf16 %v2898_v33, %v2896_v26 }
 0x5dd   : > { %v2089_v20 = vadd.f32 %v4486_v52, %v2088_v19  ;;  %v1887_v61 = vrot.slane %v1886_v46, 1  ;;  %v2077_v19 = vmul.f32 1.442695, %v1951_v53  ;;  %2188 = vmatpush.bf16.msra.mxu0 %v2167_v17  ;;  %v2029_v45 = vmul.f32 1.442695, %v1927_v43 }
 0x5de   : > { %v2033_v18 = vmul.f32 1.442695, %v1929_v30  ;;  %v2037_v53 = vmul.f32 1.442695, %v1931_v39  ;;  %v2041_v17 = vmul.f32 1.442695, %v1933_v27  ;;  %v2163_v43 = vpack.c.bf16 %v4486_v52, %v4483_v51 }
 0x5df   : > { %v2090_v23 = vadd.f32 %v2896_v26, %v2089_v20  ;;  %v4516_v20 = vmax.f32 %v1886_v46, %v1887_v61  ;;  %2905 = vpow2.f32 %v2077_v19  ;;  %v2057_v13 = vmul.f32 1.442695, %v1941_v63  ;;  %v5036_v46 = vld [vmem:[#allocation52_spill] sm:$0xff]  ;;  %v5040_v52 = vld [vmem:[#allocation50_spill] sm:$0xff] }
 0x5e0   : > { %2907 = vpow2.f32 %v2025_v44  ;;  %v2065_v10 = vmul.f32 1.442695, %v1945_v22  ;;  %v5038_v61 = vld [vmem:[#allocation48_spill] sm:$0xff] }
 0x5e1   : > { %v2091_v59 = vadd.f32 %v2898_v33, %v2090_v23  ;;  %v1943_v23 = vsub.f32 %v5035_v54, %v4400_v41  ;;  %2189 = vmatpush.bf16.msra.mxu0 %v2165_v2  ;;  %2909 = vpow2.f32 %v2029_v45  ;;  %v1890_v42 = vsub.f32 %v5036_v46, %v4516_v20  ;;  %v5037_v2 = vld [vmem:[#allocation33_spill] sm:$0xff]  ;;  %v5041_v54 = vld [vmem:[#allocation36_spill] sm:$0xff] }
 0x5e2   : > { %v1892_v1 = vsub.f32 %v4227_v55, %v4516_v20  ;;  %2911 = vpow2.f32 %v2033_v18  ;;  %v1937_v30 = vsub.f32 %v5038_v61, %v4400_v41  ;;  %v2069_v33 = vmul.f32 1.442695, %v1947_v5  ;;  %v5039_v55 = vld [vmem:[#allocation41_spill] sm:$0xff] }
 0x5e3   : > { %v2092_v35 = vadd.f32 %v2892_v60, %v2091_v59  ;;  %v4526_v60 = vpop.eup %2899  ;;  %2913 = vpow2.f32 %v2037_v53  ;;  %v1939_v18 = vsub.f32 %v5039_v55, %v4400_v41  ;;  %v1894_v19 = vsub.f32 %v5040_v52, %v4516_v20 }
 0x5e4   : > { %v4530_v9 = vpop.eup %2901  ;;  %2915 = vpow2.f32 %v2041_v17  ;;  %v1955_v63 = vmul.f32 1.442695, %v1890_v42  ;;  %v1959_v44 = vmul.f32 1.442695, %v1892_v1  ;;  %v1896_v5 = vsub.f32 %v4239_v21, %v4516_v20 }
 0x5e5   : > { %v2093_v8 = vadd.f32 %v2894_v34, %v2092_v35  ;;  %v1935_v34 = vsub.f32 %v5037_v2, %v4400_v41  ;;  %v4536_v39 = vpop.eup %2903  ;;  %2190 = vmatpush.bf16.msra.mxu0 %v2163_v43  ;;  %2917 = vpow2.f32 %v2057_v13  ;;  %v1898_v46 = vsub.f32 %v4247_v56, %v4516_v20  ;;  %v5043_v2 = vld [vmem:[#allocation40_spill] sm:$0xff] }
 0x5e6   : > { %v4541_v51 = vpop.eup %2905  ;;  %2919 = vpow2.f32 %v2065_v10  ;;  %v1963_v21 = vmul.f32 1.442695, %v1894_v19  ;;  %v1900_v10 = vsub.f32 %v4251_v62, %v4516_v20  ;;  %v1902_v56 = vsub.f32 %v4259_v28, %v4516_v20 }
 0x5e7   : > { %v2094_v26 = vadd.f32 %v2888_v29, %v2093_v8  ;;  %v2061_v29 = vmul.f32 1.442695, %v1943_v23  ;;  %v4545_v59 = vpop.eup %2907  ;;  %v2185_v41 = vpack.c.bf16 %v4541_v51, %v4536_v39  ;;  %v2045_v35 = vmul.f32 1.442695, %v1935_v34  ;;  %v5042_v23 = vld [vmem:[#allocation39_spill] sm:$0xff] }
 0x5e8   : > { %v4552_v45 = vpop.eup %2909  ;;  %2921 = vpow2.f32 %v2069_v33  ;;  %v4560_v17 = vadd.f32 %v5042_v23, %v5041_v54  ;;  %v2049_v8 = vmul.f32 1.442695, %v1937_v30  ;;  %v5044_v34 = vld [vmem:[#allocation43_spill] sm:$0xff]  ;;  %v1967_v30 = vmul.f32 1.442695, %v1896_v5 }
 0x5e9   : > { %v2095_v27 = vadd.f32 %v4491_v15, %v2094_v26  ;;  %v2161_v15 = vpack.c.bf16 %v4481_v6, %v4478_v0  ;;  %v4556_v53 = vpop.eup %2911  ;;  %2206 = vmatpush.bf16.msra.mxu1 %v2185_v41  ;;  %2923 = vpow2.f32 %v1955_v63  ;;  %v2053_v6 = vmul.f32 1.442695, %v1939_v18 }
 0x5ea   : > { %v4563_v0 = vpop.eup %2913  ;;  %2925 = vpow2.f32 %v1959_v44  ;;  %v2159_v26 = vpack.c.bf16 %v4476_v38, %v4471_v58  ;;  %v705_v61 = vadd.f32 %v5044_v34, %v5043_v2  ;;  %v1904_v62 = vsub.f32 %v4263_v49, %v4516_v20 }
 0x5eb   : > { %v2096_v22 = vadd.f32 %v4526_v60, %v2095_v27  ;;  %2191 = vmatpush.bf16.msra.mxu0 %v2161_v15  ;;  %v4567_v42 = vpop.eup %2915  ;;  %2927 = vpow2.f32 %v2061_v29  ;;  %v2157_v58 = vpack.c.bf16 %v4466_v40, %v4456_v36  ;;  %v1918_v18 = vsub.f32 %v4301_v37, %v4516_v20 }
 0x5ec   : > { %v4574_v43 = vpop.eup %2917  ;;  %2929 = vpow2.f32 %v2045_v35  ;;  %v1920_v28 = vsub.f32 %v4305_v50, %v4516_v20  ;;  %v1971_v29 = vmul.f32 1.442695, %v1898_v46  ;;  %v1975_v49 = vmul.f32 1.442695, %v1900_v10 }
 0x5ed   : > { %v2097_v13 = vadd.f32 %v4530_v9, %v2096_v22  ;;  %v4580_v33 = vpop.eup %2919  ;;  %2931 = vpow2.f32 %v2049_v8  ;;  %v2155_v19 = vpack.c.bf16 %v4446_v24, %v4441_v11  ;;  %v1906_v36 = vsub.f32 %v4271_v57, %v4516_v20  ;;  %v5045_v8 = vld [vmem:[#allocation34_spill] sm:$0xff] }
 0x5ee   : > { %v4587_v38 = vpop.eup %2921  ;;  %2933 = vpow2.f32 %v1963_v21  ;;  %v1914_v37 = vsub.f32 %v4292_v48, %v4516_v20  ;;  %v1979_v50 = vmul.f32 1.442695, %v1902_v56  ;;  %v1908_v22 = vsub.f32 %v4275_v25, %v4516_v20 }
 0x5ef   : > { %v2098_v1 = vadd.f32 %v4545_v59, %v2097_v13  ;;  %2192 = vmatpush.bf16.msra.mxu0 %v2159_v26  ;;  %v4593_v27 = vpop.eup %2923  ;;  %2935 = vpow2.f32 %v2053_v6  ;;  %v1916_v41 = vsub.f32 %v4296_v3, %v4516_v20  ;;  %v1983_v11 = vmul.f32 1.442695, %v1904_v62 }
 0x5f0   : > { %v4598_v40 = vpop.eup %2925  ;;  %2937 = vpow2.f32 %v1967_v30  ;;  %v1910_v57 = vsub.f32 %v4282_v14, %v4516_v20  ;;  %v2011_v48 = vmul.f32 1.442695, %v1918_v18  ;;  %v2015_v15 = vmul.f32 1.442695, %v1920_v28 }
 0x5f1   : > { %v2099_v55 = vadd.f32 %v4552_v45, %v2098_v1  ;;  %v2928_v63 = vpop.eup %2927  ;;  %2939 = vpow2.f32 %v1971_v29  ;;  %v2118_v25 = vadd.f32 %v4598_v40, %v4593_v27  ;;  %v2183_v3 = vpack.c.bf16 %v4587_v38, %v4580_v33 }
 0x5f2   : > { %v4609_v24 = vpop.eup %2929  ;;  %2941 = vpow2.f32 %v1975_v49  ;;  %v1912_v13 = vsub.f32 %v5045_v8, %v4516_v20  ;;  %v2003_v14 = vmul.f32 1.442695, %v1914_v37  ;;  %v2181_v6 = vpack.c.bf16 %v2928_v63, %v4574_v43 }
 0x5f3   : > { %v2100_v52 = vadd.f32 %v4556_v53, %v2099_v55  ;;  %2193 = vmatpush.bf16.msra.mxu0 %v2157_v58  ;;  %v2932_v35 = vpop.eup %2931  ;;  %2943 = vpow2.f32 %v1979_v50  ;;  %v2007_v1 = vmul.f32 1.442695, %v1916_v41  ;;  %2207 = vmatpush.bf16.msra.mxu1 %v2183_v3  ;;  %v4628_v34 = vpack.c.bf16 %v705_v61, %v4560_v17  ;;  %v5046_v3 = vld [vmem:[#allocation28_spill] sm:$0xff] }
 0x5f4   : > { %v4618_v23 = vpop.eup %2933  ;;  %2945 = vpow2.f32 %v1983_v11  ;;  %v1987_v56 = vmul.f32 1.442695, %v1906_v36  ;;  %v1991_v55 = vmul.f32 1.442695, %v1908_v22  ;;  %v1995_v18 = vmul.f32 1.442695, %v1910_v57 }
 0x5f5   : > { %v2101_v44 = vadd.f32 %v4563_v0, %v2100_v52  ;;  %v2936_v46 = vpop.eup %2935  ;;  %v2119_v10 = vadd.f32 %v4618_v23, %v2118_v25  ;;  %2947 = vpow2.f32 %v2011_v48  ;;  %v1999_v52 = vmul.f32 1.442695, %v1912_v13  ;;  %v5048_v13 = vld [vmem:[#allocation44_spill] sm:$0xff] }
 0x5f6   : > { %v4625_v26 = vpop.eup %2937  ;;  %2949 = vpow2.f32 %v2015_v15  ;;  %v2179_v37 = vpack.c.bf16 %v2936_v46, %v2932_v35  ;;  %v1950_v57 = vsub.f32 %v4430_v31, %v4516_v20  ;;  %v722_v8 = vadd.f32 %v5046_v3, %v5041_v54  ;;  %v5047_v31 = vld [vmem:[#allocation35_spill] sm:$0xff] }
 0x5f7   : > { %v2102_v5 = vadd.f32 %v4567_v42, %v2101_v44  ;;  %2194 = vmatpush.bf16.msra.mxu0 %v2155_v19  ;;  %v2120_v62 = vadd.f32 %v4625_v26, %v2119_v10  ;;  %v4631_v58 = vpop.eup %2939  ;;  %2951 = vpow2.f32 %v2003_v14  ;;  %2208 = vmatpush.bf16.msra.mxu1 %v2181_v6  ;;  %v708_v14 = vadd.f32 %v5048_v13, %v5047_v31  ;;  %v5049_v6 = vld [vmem:[#allocation37_spill] sm:$0xff] }
 0x5f8   : > { %v4634_v28 = vpop.eup %2941  ;;  %2953 = vpow2.f32 %v2007_v1  ;;  %v5051_v1 = vld [vmem:[#allocation30_spill] sm:$0xff] }
 0x5f9   : > { %v2103_v21 = vadd.f32 %v4609_v24, %v2102_v5  ;;  %v2121_v17 = vadd.f32 %v4631_v58, %v2120_v62  ;;  %v4637_v61 = vpop.eup %2943  ;;  %2955 = vpow2.f32 %v1987_v56  ;;  %v724_v10 = vadd.f32 %v5051_v1, %v5043_v2 }
 0x5fa   : > { %2195 = vmatmul.bf16.vlgmr.msra.gmra.mxu0 %v4628_v34  ;;  %v4639_v49 = vpop.eup %2945  ;;  %2957 = vpow2.f32 %v1991_v55  ;;  %v2075_v55 = vmul.f32 1.442695, %v1950_v57  ;;  %v5054_v57 = vld [vmem:[#allocation42_spill] sm:$0xff] }
 0x5fb   : > { %v2104_v30 = vadd.f32 %v2932_v35, %v2103_v21  ;;  %v2122_v36 = vadd.f32 %v4634_v28, %v2121_v17  ;;  %v4643_v50 = vpop.eup %2947  ;;  %2959 = vpow2.f32 %v1995_v18  ;;  %2209 = vmatpush.bf16.msra.mxu1 %v2179_v37  ;;  %v1952_v35 = vsub.f32 %v4464_v12, %v4516_v20 }
 0x5fc   : > { %v4645_v44 = vpop.eup %2949  ;;  %2961 = vpow2.f32 %v1999_v52  ;;  %v1926_v17 = vsub.f32 %v4317_v7, %v4516_v20 }
 0x5fd   : > { %v2105_v29 = vadd.f32 %v2936_v46, %v2104_v30  ;;  %v2123_v41 = vadd.f32 %v4637_v61, %v2122_v36  ;;  %v2952_v11 = vpop.eup %2951  ;;  %v5050_v46 = vld [vmem:[#allocation29_spill] sm:$0xff]  ;;  %v1924_v30 = vsub.f32 %v4313_v16, %v4516_v20  ;;  %v2173_v16 = vpack.c.bf16 %v4552_v45, %v4545_v59 }
 0x5fe   : > { %v2954_v48 = vpop.eup %2953  ;;  %v710_v21 = vadd.f32 %v5050_v46, %v5049_v6  ;;  %2963 = vpow2.f32 %v2075_v55  ;;  %v5057_v46 = vld [vmem:[#allocation18_spill] sm:$0xff] }
 0x5ff   : > { %v2106_v19 = vadd.f32 %v4574_v43, %v2105_v29  ;;  %v2170_v43 = vpack.c.bf16 %v4645_v44, %v4643_v50  ;;  %v2124_v5 = vadd.f32 %v4639_v49, %v2123_v41  ;;  %v4658_v25 = vpop.eup %2955  ;;  %v2168_v62 = vpack.c.bf16 %v2954_v48, %v2952_v11 }
 0x600   : > { %v2958_v12 = vpop.eup %2957  ;;  %v2079_v29 = vmul.f32 1.442695, %v1952_v35  ;;  %v4681_v52 = vpack.c.bf16 %v710_v21, %v708_v14  ;;  %v2023_v59 = vmul.f32 1.442695, %v1924_v30  ;;  %v1940_v21 = vsub.f32 %v5057_v46, %v4516_v20 }
 0x601   : > { %v2107_v22 = vadd.f32 %v2928_v63, %v2106_v19  ;;  %v2177_v63 = vpack.c.bf16 %v4609_v24, %v4567_v42  ;;  %2225 = vmatpush.bf16.msrb.mxu0 %v2170_v43  ;;  %v1946_v24 = vsub.f32 %v4394_v47, %v4516_v20  ;;  %v2125_v54 = vadd.f32 %v4658_v25, %v2124_v5  ;;  %v2960_v56 = vpop.eup %2959 }
 0x602   : > { %v2962_v18 = vpop.eup %2961  ;;  %v2175_v47 = vpack.c.bf16 %v4563_v0, %v4556_v53  ;;  %v5053_v53 = vld [vmem:[#allocation26_spill] sm:$0xff]  ;;  %v1928_v43 = vsub.f32 %v5054_v57, %v4516_v20  ;;  %2965 = vpow2.f32 %v2079_v29  ;;  %v2027_v5 = vmul.f32 1.442695, %v1926_v17 }
 0x603   : > { %v2108_v15 = vadd.f32 %v4580_v33, %v2107_v22  ;;  %v1922_v33 = vsub.f32 %v4309_v4, %v4516_v20  ;;  %2210 = vmatpush.bf16.msra.mxu1 %v2177_v63  ;;  %v1948_v4 = vsub.f32 %v4410_v32, %v4516_v20  ;;  %v2067_v37 = vmul.f32 1.442695, %v1946_v24  ;;  %v5056_v63 = vld [vmem:[#allocation20_spill] sm:$0xff] }
 0x604   : > { %v1944_v0 = vsub.f32 %v5053_v53, %v4516_v20  ;;  %v2166_v7 = vpack.c.bf16 %v2962_v18, %v2960_v56  ;;  %v1938_v3 = vsub.f32 %v5056_v63, %v4516_v20  ;;  %v2031_v1 = vmul.f32 1.442695, %v1928_v43  ;;  %v4708_v24 = vpop.eup %2963 }
 0x605   : > { %v2109_v42 = vadd.f32 %v4587_v38, %v2108_v15  ;;  %v2126_v38 = vadd.f32 %v2958_v12, %v2125_v54  ;;  %v2019_v19 = vmul.f32 1.442695, %v1922_v33  ;;  %2226 = vmatpush.bf16.msrb.mxu0 %v2168_v62  ;;  %v2071_v41 = vmul.f32 1.442695, %v1948_v4  ;;  %v5055_v15 = vld [vmem:[#allocation38_spill] sm:$0xff] }
 0x606   : > { %v1930_v35 = vsub.f32 %v5055_v15, %v4516_v20  ;;  %v2164_v33 = vpack.c.bf16 %v2958_v12, %v4658_v25  ;;  %v5060_v25 = vld [vmem:[#allocation16_spill] sm:$0xff]  ;;  %v2055_v62 = vmul.f32 1.442695, %v1940_v21  ;;  %v2156_v63 = vpack.c.bf16 %v4598_v40, %v4593_v27 }
 0x607   : > { %v2110_v2 = vadd.f32 %v4536_v39, %v2109_v42  ;;  %v5052_v39 = vld [vmem:[#allocation22_spill] sm:$0xff]  ;;  %v2127_v22 = vadd.f32 %v2960_v56, %v2126_v38  ;;  %2211 = vmatpush.bf16.msra.mxu1 %v2175_v47  ;;  %2967 = vpow2.f32 %v2019_v19  ;;  %v2171_v42 = vpack.c.bf16 %v4530_v9, %v4526_v60  ;;  %v5059_v56 = vld [vmem:[#allocation25_spill] sm:$0xff] }
 0x608   : > { %v1942_v36 = vsub.f32 %v5052_v39, %v4516_v20  ;;  %2969 = vpow2.f32 %v2067_v37  ;;  %v1934_v30 = vsub.f32 %v5059_v56, %v4516_v20  ;;  %v2035_v4 = vmul.f32 1.442695, %v1930_v35  ;;  %v4714_v55 = vpop.eup %2965  ;;  %v5062_v35 = vld [vmem:[#allocation45_spill] sm:$0xff] }
 0x609   : > { %v4688_v32 = vadd.f32 %v4541_v51, %v2110_v2  ;;  %v2128_v45 = vadd.f32 %v2962_v18, %v2127_v22  ;;  %v4696_v51 = vpack.c.bf16 %v724_v10, %v722_v8  ;;  %2227 = vmatpush.bf16.msrb.mxu0 %v2166_v7  ;;  %v2063_v8 = vmul.f32 1.442695, %v1944_v0 }
 0x60a   : > { %v2059_v13 = vmul.f32 1.442695, %v1942_v36  ;;  %2200 = vmatmul.bf16.gmra.mxu0 %v4681_v52  ;;  %2971 = vpow2.f32 %v2071_v41  ;;  %v1936_v12 = vsub.f32 %v5060_v25, %v4516_v20  ;;  %v2186_v18 = vpack.c.bf16 %v4714_v55, %v4708_v24 }
 0x60b   : > { %v2129_v14 = vadd.f32 %v2952_v11, %v2128_v45  ;;  %2212 = vmatpush.bf16.msra.mxu1 %v2173_v16  ;;  %2973 = vpow2.f32 %v2023_v59  ;;  %v5058_v11 = vld [vmem:[#allocation21_spill] sm:$0xff]  ;;  %v2162_v2 = vpack.c.bf16 %v4639_v49, %v4637_v61  ;;  %v2043_v17 = vmul.f32 1.442695, %v1934_v30  ;;  %v5061_v45 = vld [vmem:[#allocation27_spill] sm:$0xff] }
 0x60c   : > { %v1932_v54 = vsub.f32 %v5058_v11, %v4516_v20  ;;  %2975 = vpow2.f32 %v2027_v5  ;;  %v2047_v39 = vmul.f32 1.442695, %v1936_v12  ;;  %v2160_v61 = vpack.c.bf16 %v4634_v28, %v4631_v58 }
 0x60d   : > { %v2130_v10 = vadd.f32 %v2954_v48, %v2129_v14  ;;  %2228 = vmatpush.bf16.msrb.mxu0 %v2164_v33  ;;  %v2051_v48 = vmul.f32 1.442695, %v1938_v3  ;;  %2977 = vpow2.f32 %v2059_v13  ;;  %v4719_v9 = vpop.eup %2967  ;;  %v2158_v41 = vpack.c.bf16 %v4625_v26, %v4618_v23 }
 0x60e   : > { %2979 = vpow2.f32 %v2063_v8  ;;  %v2970_v29 = vpop.eup %2969  ;;  %v2039_v47 = vmul.f32 1.442695, %v1932_v54  ;;  %v727_v15 = vadd.f32 %v5061_v45, %v5047_v31  ;;  %v729_v5 = vadd.f32 %v5062_v35, %v5049_v6 }
 0x60f   : > { %v2131_v60 = vadd.f32 %v4643_v50, %v2130_v10  ;;  %2213 = vmatpush.bf16.msra.mxu1 %v2171_v42  ;;  %2981 = vpow2.f32 %v2031_v1 }
 0x610   : > { %v2972_v20 = vpop.eup %2971  ;;  %2983 = vpow2.f32 %v2035_v4  ;;  %v1564_v46 = vpack.c.bf16 %v729_v5, %v727_v15  ;;  %v2112_v4 = vrot.slane %v4688_v32, 4 }
 0x611   : > { %v2132_v38 = vadd.f32 %v4645_v44, %v2131_v60  ;;  %2229 = vmatpush.bf16.msrb.mxu0 %v2162_v2  ;;  %v2974_v50 = vpop.eup %2973  ;;  %2985 = vpow2.f32 %v2051_v48  ;;  %v2184_v36 = vpack.c.bf16 %v2972_v20, %v2970_v29 }
 0x612   : > { %2214 = vmatmul.bf16.vlgmr.msra.gmra.mxu1 %v4696_v51  ;;  %v2976_v16 = vpop.eup %2975  ;;  %2987 = vpow2.f32 %v2055_v62  ;;  %v2172_v11 = vpack.c.bf16 %v2974_v50, %v4719_v9  ;;  %v2113_v25 = vadd.f32 %v2112_v4, %v4688_v32 }
 0x613   : > { %v2133_v19 = vadd.f32 %v4719_v9, %v2132_v38  ;;  %2244 = vmatpush.bf16.msrb.mxu1 %v2186_v18  ;;  %v2978_v49 = vpop.eup %2977  ;;  %2989 = vpow2.f32 %v2039_v47 }
 0x614   : > { %v2980_v37 = vpop.eup %2979  ;;  %2991 = vpow2.f32 %v2043_v17  ;;  %v2114_v48 = vrot.slane %v2113_v25, 2 }
 0x615   : > { %v2134_v44 = vadd.f32 %v2974_v50, %v2133_v19  ;;  %2230 = vmatpush.bf16.msrb.mxu0 %v2160_v61  ;;  %v2982_v22 = vpop.eup %2981  ;;  %2993 = vpow2.f32 %v2047_v39  ;;  %v2182_v43 = vpack.c.bf16 %v2980_v37, %v2978_v49 }
 0x616   : > { %v2984_v0 = vpop.eup %2983  ;;  %v2174_v40 = vpack.c.bf16 %v2982_v22, %v2976_v16  ;;  %v2115_v9 = vadd.f32 %v2114_v48, %v2113_v25 }
 0x617   : > { %v2135_v53 = vadd.f32 %v2976_v16, %v2134_v44  ;;  %2245 = vmatpush.bf16.msrb.mxu1 %v2184_v36  ;;  %v2986_v7 = vpop.eup %2985 }
 0x618   : > { %v2988_v59 = vpop.eup %2987 }
 0x619   : > { %v2136_v57 = vadd.f32 %v2982_v22, %v2135_v53  ;;  %2231 = vmatpush.bf16.msrb.mxu0 %v2158_v41  ;;  %v2990_v28 = vpop.eup %2989  ;;  %v2180_v23 = vpack.c.bf16 %v2988_v59, %v2986_v7  ;;  %v2662_v22 = vld [vmem:[%s4819_s5] sm:$0xff] }
 0x61a   : > { %v2992_v3 = vpop.eup %2991  ;;  %v2176_v6 = vpack.c.bf16 %v2990_v28, %v2984_v0 }
 0x61b   : > { %v2137_v58 = vadd.f32 %v2984_v0, %v2136_v57  ;;  %2246 = vmatpush.bf16.msrb.mxu1 %v2182_v43  ;;  %v2994_v26 = vpop.eup %2993 }
 0x61c   : > { %v2178_v8 = vpack.c.bf16 %v2994_v26, %v2992_v3 }
 0x61d   : > { %v2138_v13 = vadd.f32 %v2990_v28, %v2137_v58  ;;  %2232 = vmatpush.bf16.msrb.mxu0 %v2156_v63  ;;  %v2663_v58 = vld [vmem:[%s4819_s5 + $0x8] sm:$0xff] }
 0x61f   : > { %v2139_v14 = vadd.f32 %v2992_v3, %v2138_v13  ;;  %2247 = vmatpush.bf16.msrb.mxu1 %v2180_v23 }
 0x620   : > { %2233 = vmatmul.bf16.vlgmr.msrb.gmra.mxu0 %v4628_v34 }
 0x621   : > { %v2140_v21 = vadd.f32 %v2994_v26, %v2139_v14 }
 0x622   : > { %2219 = vmatmul.bf16.gmra.mxu1 %v1564_v46 }
 0x623   : > { %v2141_v31 = vadd.f32 %v2986_v7, %v2140_v21  ;;  %2248 = vmatpush.bf16.msrb.mxu1 %v2178_v8 }
 0x625   : > { %v2142_v33 = vadd.f32 %v2988_v59, %v2141_v31  ;;  %v3011_v31 = vld [vmem:[%s3321_s27 + $0x40] sm:$0xff] }
 0x627   : > { %v2143_v1 = vadd.f32 %v2978_v49, %v2142_v33  ;;  %2249 = vmatpush.bf16.msrb.mxu1 %v2176_v6  ;;  %v5063_v6 = vld [vmem:[#allocation46_spill] sm:$0xff] }
 0x629   : > { %v2144_v27 = vadd.f32 %v2980_v37, %v2143_v1 }
 0x62b   : > { %v2145_v10 = vadd.f32 %v2970_v29, %v2144_v27  ;;  %2250 = vmatpush.bf16.msrb.mxu1 %v2174_v40  ;;  %v3012_v40 = vld [vmem:[%s3321_s27 + $0x50] sm:$0xff] }
 0x62d   : > { %v2146_v42 = vadd.f32 %v2972_v20, %v2145_v10 }
 0x62f   : > { %v2147_v54 = vadd.f32 %v4708_v24, %v2146_v42  ;;  %2251 = vmatpush.bf16.msrb.mxu1 %v2172_v11  ;;  %v2116_v24 = vrot.slane %v2115_v9, 1  ;;  %v5064_v42 = vld [vmem:[#allocation47_spill] sm:$0xff] }
 0x630   : > { %2238 = vmatmul.bf16.gmra.mxu0 %v4681_v52 }
 0x631   : > { %v2148_v56 = vadd.f32 %v4714_v55, %v2147_v54  ;;  %v2117_v2 = vadd.f32 %v2116_v24, %v2115_v9  ;;  %v3015_v24 = vld [vmem:[%s3321_s27 + $0x48] sm:$0xff] }
 0x632   : > { %2252 = vmatmul.bf16.vlgmr.msrb.gmra.mxu1 %v4696_v51 }
 0x633   : > { %2995 = vrcp.f32 %v2117_v2  ;;  %v2149_v32 = vrot.slane %v2148_v56, 4 }
 0x635   : > { %v2150_v49 = vadd.f32 %v2149_v32, %v2148_v56  ;;  %v3013_v56 = vld [vmem:[%s3321_s27 + $0x60] sm:$0xff] }
 0x637   : > { %v2151_v53 = vrot.slane %v2150_v49, 2 }
 0x639   : > { %v2996_v47 = vpop.eup %2995  ;;  %v2152_v0 = vadd.f32 %v2151_v53, %v2150_v49 }
 0x63b   : > { %v2153_v7 = vrot.slane %v2152_v0, 1 }
 0x63d   : > { %v2154_v43 = vadd.f32 %v2153_v7, %v2152_v0 }
 0x63f   : > { %2997 = vrcp.f32 %v2154_v43 }
 0x642   : > { %2257 = vmatmul.bf16.gmra.mxu1 %v1564_v46 }
 0x645   : > { %v2998_v63 = vpop.eup %2997 }
 0x677   : > { %v2196_v34 = vpop.f32.mrf.mxu0 }
 0x67f   : > { %v2198_v30 = vpop.f32.mrf.mxu0 }
 0x687   : > { %v2201_v60 = vpop.f32.mrf.mxu0 }
 0x68f   : > { %v2215_v12 = vpop.f32.mrf.mxu1  ;;  %v2203_v18 = vpop.f32.mrf.mxu0 }
 0x690   : > { %v2216_v50 = vadd.f32 %v2215_v12, %v2196_v34  ;;  %v3014_v12 = vld [vmem:[%s3321_s27 + $0x70] sm:$0xff] }
 0x692   : > { %v2265_v61 = vmul.f32 %v2996_v47, %v2216_v50 }
 0x697   : > { %v2217_v62 = vpop.f32.mrf.mxu1 }
 0x698   : > { %v2218_v38 = vadd.f32 %v2217_v62, %v2198_v30  ;;  %v5065_v30 = vld [vmem:[#allocation49_spill] sm:$0xff] }
 0x69a   : > { %v2267_v16 = vmul.f32 %v2996_v47, %v2218_v38 }
 0x69c   : > { %v2277_v36 = vpack.c.bf16 %v2267_v16, %v2265_v61 }
 0x69d   : > { %v2234_v51 = vpop.f32.mrf.mxu0 }
 0x69f   : > { %v2220_v55 = vpop.f32.mrf.mxu1 }
 0x6a0   : > { %v2221_v52 = vadd.f32 %v2220_v55, %v2201_v60  ;;  %v5066_v60 = vld [vmem:[#allocation51_spill] sm:$0xff] }
 0x6a2   : > { %v2269_v17 = vmul.f32 %v2996_v47, %v2221_v52  ;;  %v3016_v52 = vld [vmem:[%s3321_s27 + $0x58] sm:$0xff] }
 0x6a5   : > { %v2236_v37 = vpop.f32.mrf.mxu0 }
 0x6a7   : > { %v2222_v29 = vpop.f32.mrf.mxu1 }
 0x6a8   : > { %v2223_v20 = vadd.f32 %v2222_v29, %v2203_v18 }
 0x6aa   : > { %v2271_v19 = vmul.f32 %v2996_v47, %v2223_v20  ;;  %v3017_v20 = vld [vmem:[%s3321_s27 + $0x68] sm:$0xff] }
 0x6ac   : > { %v2279_v39 = vpack.c.bf16 %v2271_v19, %v2269_v17  ;;  %v3018_v19 = vld [vmem:[%s3321_s27 + $0x78] sm:$0xff] }
 0x6ad   : > { %v2239_v57 = vpop.f32.mrf.mxu0 }
 0x6ae   : > { %2303 = vmatpush.bf16.msra.mxu0 %v2279_v39 }
 0x6af   : > { %v2253_v44 = vpop.f32.mrf.mxu1 }
 0x6b0   : > { %v2254_v3 = vadd.f32 %v2253_v44, %v2234_v51 }
 0x6b2   : > { %2304 = vmatpush.bf16.msra.mxu0 %v2277_v36  ;;  %v2266_v46 = vmul.f32 %v2998_v63, %v2254_v3 }
 0x6b5   : > { %2632 = vmatmul.msk.bf16.vlgmr.msra.gmra.mxu0 %vm536_vm1, %v2662_v22  ;;  %v2241_v28 = vpop.f32.mrf.mxu0 }
 0x6b7   : > { %v2255_v41 = vpop.f32.mrf.mxu1 }
 0x6b8   : > { %v2256_v35 = vadd.f32 %v2255_v41, %v2236_v37 }
 0x6ba   : > { %v2268_v26 = vmul.f32 %v2998_v63, %v2256_v35 }
 0x6bc   : > { %v2278_v21 = vpack.c.bf16 %v2268_v26, %v2266_v46 }
 0x6bf   : > { %v2258_v59 = vpop.f32.mrf.mxu1 }
 0x6c0   : > { %v2259_v45 = vadd.f32 %v2258_v59, %v2239_v57 }
 0x6c2   : > { %v2270_v13 = vmul.f32 %v2998_v63, %v2259_v45 }
 0x6c5   : > { %2633 = vmatmul.msk.bf16.gmra.mxu0 %vm536_vm1, %v2663_v58 }
 0x6c7   : > { %v2260_v15 = vpop.f32.mrf.mxu1 }
 0x6c8   : > { %v2261_v5 = vadd.f32 %v2260_v15, %v2241_v28 }
 0x6ca   : > { %v2272_v23 = vmul.f32 %v2998_v63, %v2261_v5 }
 0x6cc   : > { %v2280_v14 = vpack.c.bf16 %v2272_v23, %v2270_v13 }
 0x6ce   : > { %2322 = vmatpush.bf16.msra.mxu1 %v2280_v14 }
 0x6d2   : > { %2323 = vmatpush.bf16.msra.mxu1 %v2278_v21 }
 0x6d5   : > { %2634 = vmatmul.msk.bf16.vlgmr.msra.gmra.mxu1 %vm536_vm1, %v2662_v22 }
 0x6e5   : > { %2635 = vmatmul.msk.bf16.gmra.mxu1 %vm536_vm1, %v2663_v58 }
 0x732   : > { %v2306_v8 = vpop.f32.mrf.mxu0 }
 0x733   : > { %v2335_v33 = vadd.f32 %v3011_v31, %v2306_v8 }
 0x735   : > { %v2343_v1 = vadd.f32 %v2335_v33, %v5063_v6 }
 0x737   : > { %2636 = vst [vmem:[%s4171_s30 + $0x40] sm:$0xff] %v2343_v1 }
 0x73a   : > { %v2308_v27 = vpop.f32.mrf.mxu0 }
 0x73b   : > { %v2337_v10 = vadd.f32 %v3012_v40, %v2308_v27 }
 0x73d   : > { %v2345_v11 = vadd.f32 %v2337_v10, %v5064_v42 }
 0x73f   : > { %2638 = vst [vmem:[%s4171_s30 + $0x50] sm:$0xff] %v2345_v11 }
 0x742   : > { %v2311_v54 = vpop.f32.mrf.mxu0 }
 0x743   : > { %v2339_v34 = vadd.f32 %v3013_v56, %v2311_v54 }
 0x745   : > { %v2347_v4 = vadd.f32 %v2339_v34, %v5065_v30 }
 0x747   : > { %2640 = vst [vmem:[%s4171_s30 + $0x60] sm:$0xff] %v2347_v4 }
 0x74a   : > { %v2313_v25 = vpop.f32.mrf.mxu0 }
 0x74b   : > { %v2341_v48 = vadd.f32 %v3014_v12, %v2313_v25 }
 0x74d   : > { %v2349_v9 = vadd.f32 %v2341_v48, %v5066_v60 }
 0x74f   : > { %2642 = vst [vmem:[%s4171_s30 + $0x70] sm:$0xff] %v2349_v9 }
 0x752   : > { %v2325_v62 = vpop.f32.mrf.mxu1 }
 0x753   : > { %v2336_v18 = vadd.f32 %v3015_v24, %v2325_v62 }
 0x755   : > { %v2344_v2 = vadd.f32 %v2336_v18, %v5063_v6 }
 0x757   : > { %2637 = vst [vmem:[%s4171_s30 + $0x48] sm:$0xff] %v2344_v2 }
 0x75a   : > { %v2327_v55 = vpop.f32.mrf.mxu1 }
 0x75b   : > { %v2338_v29 = vadd.f32 %v3016_v52, %v2327_v55 }
 0x75d   : > { %v2346_v51 = vadd.f32 %v2338_v29, %v5064_v42 }
 0x75f   : > { %2639 = vst [vmem:[%s4171_s30 + $0x58] sm:$0xff] %v2346_v51 }
 0x762   : > { %v2330_v38 = vpop.f32.mrf.mxu1 }
 0x763   : > { %v2340_v47 = vadd.f32 %v3017_v20, %v2330_v38 }
 0x765   : > { %v2348_v50 = vadd.f32 %v2340_v47, %v5065_v30 }
 0x767   : > { %2641 = vst [vmem:[%s4171_s30 + $0x68] sm:$0xff] %v2348_v50 }
 0x76a   : > { %v2332_v17 = vpop.f32.mrf.mxu1 }
 0x76b   : > { %v2342_v32 = vadd.f32 %v3018_v19, %v2332_v17 }
 0x76d   : > { %v2350_v16 = vadd.f32 %v2342_v32, %v5066_v60 }
 0x76f   : > { %2643 = vst [vmem:[%s4171_s30 + $0x78] sm:$0xff] %v2350_v16 }
 0x770   : > { %3106 = shalt.err (!%p3103_p0)
}
 0x771   : > { %s3157_s0 = smov 256   ;;  %s3158_s26 = smov 16  }
 0x772   : > { %2670 = dma.vmem_to_hbm [thread:$0]  (%p3249_p11), %s2375_s18, 2048, %s2377_s19, %s2361_s21, %s3157_s0, %s3157_s0, %s3158_s26  }
 0x773 PF: > { %s5068_s15 = sld [smem:[#allocation12_spill]]  ;;  %s2391_s14 = sand.u32 1, %s3137_s24  }
 0x774   : > { %s2392_s29 = scalar_lea.sflag [#allocation4], %s2391_s14 }
 0x779   : > { %p5069_p1 = scmp.ge.s32.totalorder %s5068_s15, 2 }
 0x77b   : > { %p2680_p4 = pnand %p5069_p1, %p3253_p12 }
 0x77d   : > { %p2681_p7 = pneg %p2680_p4 }
 0x77f   : > { %3132 = dma.done.wait (%p2681_p7), %s2392_s29, 2048  }
 0x780   : > { %3134 = vsyncadd (%p2681_p7), %s2392_s29, 4294965248  ;;  %s5070_s27 = sld [smem:[#allocation13_spill]]  ;;  %s5073_s24 = smov %s3141_s25 }
 0x781   : > { %s5071_s20 = sld [smem:[#allocation11_spill]] }
 0x782   : > { %s5072_s26 = sld [smem:[#allocation14_spill]] }
 0x786   : > { %p23_p5 = scmp.ge.s32.totalorder %s5070_s27, 4  }
 0x787   : > { %s5074_s25 = smov %s5071_s20 }
 0x788   :  { %25 = sbr.rel (!%p23_p5) target bundleno = 9 (0x9), region = 109 }
 0x78d   :  { %2398 = vsyncpa [#allocation3], 1 }
 0x78e   :  { %2400 = vsyncpa [#allocation3 + $0x1], 1 }
 0x78f   :  { %2401 = vsyncpa [#allocation6], 1 }
 0x790   :  { %2403 = vsyncpa [#allocation6 + $0x1], 1 }
 0x791   :  { %2404 = vsyncpa [#allocation4], 1 }
 0x792   :  { %2406 = vsyncpa [#allocation4 + $0x1], 1 }

</bundles_post_ra>
